<compile_context>
chip_gen: v6e
topology: v6e:2x2x1
jax: 0.10.0
libtpu: 0.0.40
codegen_flags: <defaults>
</compile_context>

<pallas_src>
import functools

import jax
import jax.numpy as jnp
from jax.experimental import pallas as pl
from jax.experimental.pallas import tpu as pltpu


# ----------------------------------------------------------------------------
# In-kernel helpers
# ----------------------------------------------------------------------------
def _layer_norm(x, g, b, eps):
    mu = jnp.mean(x, axis=-1, keepdims=True)
    var = jnp.mean(jnp.square(x - mu), axis=-1, keepdims=True)
    return (x - mu) * jax.lax.rsqrt(var + eps) * g + b


# ----------------------------------------------------------------------------
# Kernel 1: fused CNN encoder (3 convs as dense matmuls) + vector quantizer
# ----------------------------------------------------------------------------
def _cnn_vq_kernel(x_ref, w1, b1, w2, b2, w3, b3, cbt, esq,
                   idx_ref, loss_ref, *, T, D, beta):
    h = jnp.dot(x_ref[...], w1[...], preferred_element_type=jnp.float32) + b1[...]
    h = jnp.maximum(h, 0.0)
    h = jnp.dot(h, w2[...], preferred_element_type=jnp.float32) + b2[...]
    h = jnp.maximum(h, 0.0)
    zf = jnp.dot(h, w3[...], preferred_element_type=jnp.float32) + b3[...]   # (B, T*D)

    V = cbt.shape[1]
    idx_cols = []
    md_cols = []
    # Per latent timestep: (B, D) block -> distances to codebook -> argmin.
    for t in range(T):
        z_t = zf[:, t * D:(t + 1) * D]                                        # (B, D)
        zsq = jnp.sum(z_t * z_t, axis=1, keepdims=True)                       # (B, 1)
        dist = (zsq
                - 2.0 * jnp.dot(z_t, cbt[...], preferred_element_type=jnp.float32)
                + esq[...])                                                   # (B, V)
        min_d = jnp.min(dist, axis=1, keepdims=True)
        col = jax.lax.broadcasted_iota(jnp.int32, dist.shape, 1)
        cand = jnp.where(dist <= min_d, col, V)        # first index achieving the min
        idx_cols.append(jnp.min(cand, axis=1, keepdims=True).astype(jnp.int32))
        md_cols.append(jnp.maximum(min_d, 0.0))

    idx_ref[...] = jnp.concatenate(idx_cols, axis=1)                          # (B, T)

    # Forward value of the standard VQ-VAE loss (stop-gradients irrelevant here).
    mse = jnp.mean(jnp.concatenate(md_cols, axis=1)) / D
    loss_ref[...] = jnp.reshape((1.0 + beta) * mse, (1, 1))


def fused_cnn_vq(x_flat, cp, *, beta):
    """x_flat: (B, L*Cin).  Returns (indices (B, T) int32, embedding_loss scalar)."""
    B = x_flat.shape[0]
    D = cp["cb_t"].shape[0]
    T = cp["w3"].shape[1] // D
    full2 = lambda i: (0, 0)
    idx, loss = pl.pallas_call(
        functools.partial(_cnn_vq_kernel, T=T, D=D, beta=beta),
        out_shape=(jax.ShapeDtypeStruct((B, T), jnp.int32),
                   jax.ShapeDtypeStruct((1, 1), jnp.float32)),
        grid=(1,),
        in_specs=[pl.BlockSpec(x_flat.shape, full2),
                  pl.BlockSpec(cp["w1"].shape, full2),
                  pl.BlockSpec(cp["b1"].shape, full2),
                  pl.BlockSpec(cp["w2"].shape, full2),
                  pl.BlockSpec(cp["b2"].shape, full2),
                  pl.BlockSpec(cp["w3"].shape, full2),
                  pl.BlockSpec(cp["b3"].shape, full2),
                  pl.BlockSpec(cp["cb_t"].shape, full2),
                  pl.BlockSpec(cp["e_sq"].shape, full2)],
        out_specs=(pl.BlockSpec((B, T), full2),
                   pl.BlockSpec((1, 1), full2)),
        compiler_params=pltpu.CompilerParams(dimension_semantics=("arbitrary",)),
    )(x_flat, cp["w1"], cp["b1"], cp["w2"], cp["b2"], cp["w3"], cp["b3"],
      cp["cb_t"], cp["e_sq"])
    return idx, loss[0, 0]


# ----------------------------------------------------------------------------
# Kernel 2: the whole BERT stack in one pallas_call (grid over layers)
# ----------------------------------------------------------------------------
def _bert_kernel(emb_ref, eg_ref, eb_ref,
                 wqkv_ref, bqkv_ref, wo_ref, bo_ref, g1_ref, be1_ref,
                 w1_ref, b1_ref, w2_ref, b2_ref, g2_ref, be2_ref,
                 pw_ref, pb_ref,
                 hid_ref, pool_ref, x_vmem, *, B, L, n_heads, eps):
    i = pl.program_id(0)

    @pl.when(i == 0)
    def _():  # embedding-sum LayerNorm folded into the first grid step
        x_vmem[...] = _layer_norm(emb_ref[...], eg_ref[...], eb_ref[...], eps)

    x = x_vmem[...]                      # (B*L, H), resident in VMEM across layers
    H = x.shape[1]
    dh = H // n_heads
    scale = 1.0 / (dh ** 0.5)

    # Fused QKV projection: one lane-dense (H, 3H) matmul.
    qkv = jnp.dot(x, wqkv_ref[0], preferred_element_type=jnp.float32) + bqkv_ref[0]

    # Attention: heads via static slices, no host-side split/merge transposes.
    ctx_batches = []
    for b in range(B):
        r0 = b * L
        heads = []
        for h in range(n_heads):
            c0 = h * dh
            qh = qkv[r0:r0 + L, c0:c0 + dh]
            kh = qkv[r0:r0 + L, H + c0:H + c0 + dh]
            vh = qkv[r0:r0 + L, 2 * H + c0:2 * H + c0 + dh]
            s = jnp.dot(qh, kh.T, preferred_element_type=jnp.float32) * scale
            m = jnp.max(s, axis=-1, keepdims=True)
            p = jnp.exp(s - m)
            p = p * pl.reciprocal(jnp.sum(p, axis=-1, keepdims=True), approx=True)
            heads.append(jnp.dot(p, vh, preferred_element_type=jnp.float32))
        ctx_batches.append(jnp.concatenate(heads, axis=1))       # (L, H)
    ctx = jnp.concatenate(ctx_batches, axis=0)                   # (B*L, H)

    attn = jnp.dot(ctx, wo_ref[0], preferred_element_type=jnp.float32) + bo_ref[0]
    x = _layer_norm(x + attn, g1_ref[0], be1_ref[0], eps)

    ff = jnp.dot(x, w1_ref[0], preferred_element_type=jnp.float32) + b1_ref[0]
    # TODO(synk): HF bert-base uses exact erf GELU; tanh approximation kept here.
    ff = jax.nn.gelu(ff)
    ff = jnp.dot(ff, w2_ref[0], preferred_element_type=jnp.float32) + b2_ref[0]
    x = _layer_norm(x + ff, g2_ref[0], be2_ref[0], eps)

    x_vmem[...] = x

    @pl.when(i == pl.num_programs(0) - 1)
    def _():  # write final hidden states + pooler on the [CLS] rows only once
        hid_ref[...] = x
        cls = jnp.concatenate([x[b * L:b * L + 1, :] for b in range(B)], axis=0)
        pool_ref[...] = jnp.tanh(
            jnp.dot(cls, pw_ref[...], preferred_element_type=jnp.float32) + pb_ref[...])


def fused_bert(emb, bp, *, B, L, n_heads):
    """emb: (B*L, H) summed embeddings.  Returns (last_hidden (B,L,H), pooled (B,H))."""
    H = emb.shape[1]
    n_layers = bp["wqkv"].shape[0]
    d_ff = bp["w1"].shape[2]
    full2 = lambda i: (0, 0)
    stk3 = lambda i: (i, 0, 0)
    in_specs = [
        pl.BlockSpec((B * L, H), full2),       # emb
        pl.BlockSpec((1, H), full2),           # emb_ln_g
        pl.BlockSpec((1, H), full2),           # emb_ln_b
        pl.BlockSpec((1, H, 3 * H), stk3),     # wqkv (stacked per layer)
        pl.BlockSpec((1, 1, 3 * H), stk3),     # bqkv
        pl.BlockSpec((1, H, H), stk3),         # wo
        pl.BlockSpec((1, 1, H), stk3),         # bo
        pl.BlockSpec((1, 1, H), stk3),         # ln1_g
        pl.BlockSpec((1, 1, H), stk3),         # ln1_b
        pl.BlockSpec((1, H, d_ff), stk3),      # w1
        pl.BlockSpec((1, 1, d_ff), stk3),      # b1
        pl.BlockSpec((1, d_ff, H), stk3),      # w2
        pl.BlockSpec((1, 1, H), stk3),         # b2
        pl.BlockSpec((1, 1, H), stk3),         # ln2_g
        pl.BlockSpec((1, 1, H), stk3),         # ln2_b
        pl.BlockSpec((H, H), full2),           # pool_w
        pl.BlockSpec((1, H), full2),           # pool_b
    ]
    hid, pooled = pl.pallas_call(
        functools.partial(_bert_kernel, B=B, L=L, n_heads=n_heads, eps=1e-12),
        out_shape=(jax.ShapeDtypeStruct((B * L, H), jnp.float32),
                   jax.ShapeDtypeStruct((B, H), jnp.float32)),
        grid=(n_layers,),
        in_specs=in_specs,
        out_specs=(pl.BlockSpec((B * L, H), full2),
                   pl.BlockSpec((B, H), full2)),
        scratch_shapes=[pltpu.VMEM((B * L, H), jnp.float32)],
        compiler_params=pltpu.CompilerParams(dimension_semantics=("arbitrary",)),
    )(emb,
      bp["emb_ln_g"], bp["emb_ln_b"],
      bp["wqkv"], bp["bqkv"], bp["wo"], bp["bo"], bp["ln1_g"], bp["ln1_b"],
      bp["w1"], bp["b1"], bp["w2"], bp["b2"], bp["ln2_g"], bp["ln2_b"],
      bp["pool_w"], bp["pool_b"])
    return hid.reshape(B, L, H), pooled


# ----------------------------------------------------------------------------
# Forward (mirrors TimeSeriesBertEncoder.forward)
# ----------------------------------------------------------------------------
def time_series_bert_encoder(src, prm, beta, n_heads):
    seq_len, bsz, cin = src.shape
    # channels-last, flattened (l, c) — matches the pre-unrolled conv matrices.
    x_flat = jnp.transpose(src, (1, 0, 2)).reshape(bsz, seq_len * cin)

    cnn = prm["cnn"]
    idx, embedding_loss = fused_cnn_vq(x_flat, cnn, beta=beta)          # (B, T)

    min_encoding_idx = idx + 200
    cls_tokens = jnp.full((bsz, 1), 101, dtype=jnp.int32)   # cls_token_id
    sep_tokens = jnp.full((bsz, 1), 102, dtype=jnp.int32)   # sep_token_id
    token_ids = jnp.concatenate((cls_tokens, min_encoding_idx, sep_tokens), axis=1)

    bp = prm["bert"]
    B, L = token_ids.shape
    H = bp["word_emb"].shape[1]
    we = bp["word_emb"][token_ids]                   # (B, L, H) gather (plain-JAX glue)
    pe = bp["pos_emb"][:L][None, :, :]
    te = bp["type_emb"][0][None, None, :]
    emb = (we + pe + te).reshape(B * L, H).astype(jnp.float32)

    last_hidden, pooled = fused_bert(emb, bp, B=B, L=L, n_heads=n_heads)
    return last_hidden, pooled, embedding_loss, token_ids


# ----------------------------------------------------------------------------
# Parameter initialization & one-time preparation (unrolled convs, stacking)
# ----------------------------------------------------------------------------
def init_params(seed, in_channel, h_dim, vocab_size, bert_vocab, n_layers, d_ff, max_pos):
    key = jax.random.PRNGKey(seed)

    def nxt():
        nonlocal key
        key, sub = jax.random.split(key)
        return sub

    def dense(shape, scale=0.02):
        return (scale * jax.random.normal(nxt(), shape)).astype(jnp.float32)

    H = h_dim
    emb = {
        "conv1_w": dense((4, in_channel, H)), "conv1_b": jnp.zeros((H,), jnp.float32),
        "conv2_w": dense((4, H, H)), "conv2_b": jnp.zeros((H,), jnp.float32),
        "conv3_w": dense((3, H, H)), "conv3_b": jnp.zeros((H,), jnp.float32),
        "codebook": dense((vocab_size, H), scale=1.0 / vocab_size),
    }
    layers = []
    for _ in range(n_layers):
        layers.append({
            "wq": dense((H, H)), "bq": jnp.zeros((H,), jnp.float32),
            "wk": dense((H, H)), "bk": jnp.zeros((H,), jnp.float32),
            "wv": dense((H, H)), "bv": jnp.zeros((H,), jnp.float32),
            "wo": dense((H, H)), "bo": jnp.zeros((H,), jnp.float32),
            "ln1_g": jnp.ones((H,), jnp.float32), "ln1_b": jnp.zeros((H,), jnp.float32),
            "w1": dense((H, d_ff)), "b1": jnp.zeros((d_ff,), jnp.float32),
            "w2": dense((d_ff, H)), "b2": jnp.zeros((H,), jnp.float32),
            "ln2_g": jnp.ones((H,), jnp.float32), "ln2_b": jnp.zeros((H,), jnp.float32),
        })
    bert = {
        "word_emb": dense((bert_vocab, H)),
        "pos_emb": dense((max_pos, H)),
        "type_emb": dense((2, H)),
        "emb_ln_g": jnp.ones((H,), jnp.float32), "emb_ln_b": jnp.zeros((H,), jnp.float32),
        "layers": layers,
        "pool_w": dense((H, H)), "pool_b": jnp.zeros((H,), jnp.float32),
    }
    return {"embedding": emb, "bert": bert}


def _unroll_conv(w, b, lin, stride, padding):
    """Conv1d (channels-last, w: [K, Cin, Cout]) -> dense (Lin*Cin, Lout*Cout) matrix."""
    K, Cin, Cout = w.shape
    lout = (lin + 2 * padding - K) // stride + 1
    W = jnp.zeros((lin * Cin, lout * Cout), jnp.float32)
    for t in range(lout):
        for k in range(K):
            l = stride * t + k - padding
            if 0 <= l < lin:
                W = W.at[l * Cin:(l + 1) * Cin, t * Cout:(t + 1) * Cout].set(w[k])
    b_big = jnp.tile(b, lout).reshape(1, lout * Cout)
    return W, b_big, lout


def prepare_params(params, seq_len):
    """One-time reshaping: unroll convs, fuse QKV, stack layer params, pre-reshape biases."""
    e = params["embedding"]
    W1, B1, L1 = _unroll_conv(e["conv1_w"], e["conv1_b"], seq_len, stride=2, padding=1)
    W2, B2, L2 = _unroll_conv(e["conv2_w"], e["conv2_b"], L1, stride=2, padding=1)
    W3, B3, _ = _unroll_conv(e["conv3_w"], e["conv3_b"], L2, stride=1, padding=1)
    cnn = {
        "w1": W1, "b1": B1, "w2": W2, "b2": B2, "w3": W3, "b3": B3,
        "cb_t": e["codebook"].T,                                         # (D, V)
        "e_sq": jnp.sum(e["codebook"] ** 2, axis=1).reshape(1, -1),      # (1, V)
    }

    b = params["bert"]
    layers = b["layers"]

    def stk(f):
        return jnp.stack([f(lp) for lp in layers], axis=0)

    bert = {
        "word_emb": b["word_emb"], "pos_emb": b["pos_emb"], "type_emb": b["type_emb"],
        "emb_ln_g": b["emb_ln_g"].reshape(1, -1), "emb_ln_b": b["emb_ln_b"].reshape(1, -1),
        "wqkv": stk(lambda lp: jnp.concatenate([lp["wq"], lp["wk"], lp["wv"]], axis=1)),
        "bqkv": stk(lambda lp: jnp.concatenate([lp["bq"], lp["bk"], lp["bv"]]).reshape(1, -1)),
        "wo": stk(lambda lp: lp["wo"]),
        "bo": stk(lambda lp: lp["bo"].reshape(1, -1)),
        "ln1_g": stk(lambda lp: lp["ln1_g"].reshape(1, -1)),
        "ln1_b": stk(lambda lp: lp["ln1_b"].reshape(1, -1)),
        "w1": stk(lambda lp: lp["w1"]),
        "b1": stk(lambda lp: lp["b1"].reshape(1, -1)),
        "w2": stk(lambda lp: lp["w2"]),
        "b2": stk(lambda lp: lp["b2"].reshape(1, -1)),
        "ln2_g": stk(lambda lp: lp["ln2_g"].reshape(1, -1)),
        "ln2_b": stk(lambda lp: lp["ln2_b"].reshape(1, -1)),
        "pool_w": b["pool_w"], "pool_b": b["pool_b"].reshape(1, -1),
    }
    return {"cnn": cnn, "bert": bert}


# ----------------------------------------------------------------------------
if __name__ == "__main__":
    # Small shapes consistent with forward(): src [seq_len, batch_size, 1]
    seq_len, batch, in_channel = 16, 2, 1
    h_dim = 32
    vocab_size = 16
    beta = 0.25
    n_heads = 4
    n_layers = 2
    d_ff = 4 * h_dim
    bert_vocab = 256      # covers 101, 102 and 200..200+vocab_size-1
    max_pos = 16

    raw_params = init_params(seed=0, in_channel=in_channel, h_dim=h_dim,
                             vocab_size=vocab_size, bert_vocab=bert_vocab,
                             n_layers=n_layers, d_ff=d_ff, max_pos=max_pos)
    prm = prepare_params(raw_params, seq_len)

    src = jax.random.normal(jax.random.PRNGKey(0), (seq_len, batch, in_channel),
                            dtype=jnp.float32)

    fwd = jax.jit(lambda s, p: time_series_bert_encoder(s, p, beta, n_heads))
    last_hidden, pooled, emb_loss, token_ids = fwd(src, prm)
    jax.block_until_ready((last_hidden, pooled, emb_loss, token_ids))

    T = seq_len // 4          # latent tokens after two stride-2 convs
    assert last_hidden.shape == (batch, T + 2, h_dim)
    assert pooled.shape == (batch, h_dim)
    assert emb_loss.shape == ()
    assert token_ids.shape == (batch, T + 2)
    assert bool(jnp.all(jnp.isfinite(last_hidden)))
    assert bool(jnp.all(jnp.isfinite(pooled)))

    print("KERNEL_OK")
</pallas_src>

<mosaic_0001>
module attributes {stable_mosaic.version = 11 : i64} {
  func.func @_cnn_vq_kernel(%arg0: i32, %arg1: memref<2x16xf32, #tpu.memory_space<vmem>>, %arg2: memref<16x256xf32, #tpu.memory_space<vmem>>, %arg3: memref<1x256xf32, #tpu.memory_space<vmem>>, %arg4: memref<256x128xf32, #tpu.memory_space<vmem>>, %arg5: memref<1x128xf32, #tpu.memory_space<vmem>>, %arg6: memref<128x128xf32, #tpu.memory_space<vmem>>, %arg7: memref<1x128xf32, #tpu.memory_space<vmem>>, %arg8: memref<32x16xf32, #tpu.memory_space<vmem>>, %arg9: memref<1x16xf32, #tpu.memory_space<vmem>>, %arg10: memref<2x4xi32, #tpu.memory_space<vmem>>, %arg11: memref<1x1xf32, #tpu.memory_space<vmem>>) attributes {dimension_semantics = [#tpu.dimension_semantics<arbitrary>], iteration_bounds = array<i64: 1>, scalar_prefetch = 0 : i64, scratch_operands = 0 : i64, tpu.core_type = #tpu.core_type<tc>, window_params = [{pipeline_mode = #tpu.pipeline_mode<synchronous>, transform_indices = @transform_0, window_bounds = array<i64: 2, 16>}, {pipeline_mode = #tpu.pipeline_mode<synchronous>, transform_indices = @transform_1, window_bounds = array<i64: 16, 256>}, {pipeline_mode = #tpu.pipeline_mode<synchronous>, transform_indices = @transform_2, window_bounds = array<i64: 1, 256>}, {pipeline_mode = #tpu.pipeline_mode<synchronous>, transform_indices = @transform_3, window_bounds = array<i64: 256, 128>}, {pipeline_mode = #tpu.pipeline_mode<synchronous>, transform_indices = @transform_4, window_bounds = array<i64: 1, 128>}, {pipeline_mode = #tpu.pipeline_mode<synchronous>, transform_indices = @transform_5, window_bounds = array<i64: 128, 128>}, {pipeline_mode = #tpu.pipeline_mode<synchronous>, transform_indices = @transform_6, window_bounds = array<i64: 1, 128>}, {pipeline_mode = #tpu.pipeline_mode<synchronous>, transform_indices = @transform_7, window_bounds = array<i64: 32, 16>}, {pipeline_mode = #tpu.pipeline_mode<synchronous>, transform_indices = @transform_8, window_bounds = array<i64: 1, 16>}, {pipeline_mode = #tpu.pipeline_mode<synchronous>, transform_indices = @transform_9, window_bounds = array<i64: 2, 4>}, {pipeline_mode = #tpu.pipeline_mode<synchronous>, transform_indices = @transform_10, window_bounds = array<i64: 1, 1>}]} {
    %c0 = arith.constant 0 : index
    %c0_0 = arith.constant 0 : index
    %0 = vector.load %arg1[%c0, %c0_0] : memref<2x16xf32, #tpu.memory_space<vmem>>, vector<2x16xf32>
    %c0_1 = arith.constant 0 : index
    %c0_2 = arith.constant 0 : index
    %1 = vector.load %arg2[%c0_1, %c0_2] : memref<16x256xf32, #tpu.memory_space<vmem>>, vector<16x256xf32>
    %cst = arith.constant dense<0.000000e+00> : vector<2x256xf32>
    %2 = tpu.matmul %0, %1, %cst {dimension_numbers = #tpu.dot_dimension_numbers<[1], [0], [0], [1], [0, 0, 1, 1], [], []>} : vector<2x16xf32>, vector<16x256xf32>, vector<2x256xf32> -> vector<2x256xf32>
    %c0_3 = arith.constant 0 : index
    %c0_4 = arith.constant 0 : index
    %3 = vector.load %arg3[%c0_3, %c0_4] : memref<1x256xf32, #tpu.memory_space<vmem>>, vector<1x256xf32>
    %4 = vector.broadcast %3 : vector<1x256xf32> to vector<2x256xf32>
    %5 = arith.addf %2, %4 : vector<2x256xf32>
    %cst_5 = arith.constant 0.000000e+00 : f32
    %6 = vector.broadcast %cst_5 : f32 to vector<2x256xf32>
    %7 = arith.maximumf %5, %6 : vector<2x256xf32>
    %c0_6 = arith.constant 0 : index
    %c0_7 = arith.constant 0 : index
    %8 = vector.load %arg4[%c0_6, %c0_7] : memref<256x128xf32, #tpu.memory_space<vmem>>, vector<256x128xf32>
    %cst_8 = arith.constant dense<0.000000e+00> : vector<2x128xf32>
    %9 = tpu.matmul %7, %8, %cst_8 {dimension_numbers = #tpu.dot_dimension_numbers<[1], [0], [0], [1], [0, 0, 1, 1], [], []>} : vector<2x256xf32>, vector<256x128xf32>, vector<2x128xf32> -> vector<2x128xf32>
    %c0_9 = arith.constant 0 : index
    %c0_10 = arith.constant 0 : index
    %10 = vector.load %arg5[%c0_9, %c0_10] : memref<1x128xf32, #tpu.memory_space<vmem>>, vector<1x128xf32>
    %11 = vector.broadcast %10 : vector<1x128xf32> to vector<2x128xf32>
    %12 = arith.addf %9, %11 : vector<2x128xf32>
    %cst_11 = arith.constant 0.000000e+00 : f32
    %13 = vector.broadcast %cst_11 : f32 to vector<2x128xf32>
    %14 = arith.maximumf %12, %13 : vector<2x128xf32>
    %c0_12 = arith.constant 0 : index
    %c0_13 = arith.constant 0 : index
    %15 = vector.load %arg6[%c0_12, %c0_13] : memref<128x128xf32, #tpu.memory_space<vmem>>, vector<128x128xf32>
    %cst_14 = arith.constant dense<0.000000e+00> : vector<2x128xf32>
    %16 = tpu.matmul %14, %15, %cst_14 {dimension_numbers = #tpu.dot_dimension_numbers<[1], [0], [0], [1], [0, 0, 1, 1], [], []>} : vector<2x128xf32>, vector<128x128xf32>, vector<2x128xf32> -> vector<2x128xf32>
    %c0_15 = arith.constant 0 : index
    %c0_16 = arith.constant 0 : index
    %17 = vector.load %arg7[%c0_15, %c0_16] : memref<1x128xf32, #tpu.memory_space<vmem>>, vector<1x128xf32>
    %18 = vector.broadcast %17 : vector<1x128xf32> to vector<2x128xf32>
    %19 = arith.addf %16, %18 : vector<2x128xf32>
    %20 = vector.extract_strided_slice %19 {offsets = [0, 0], sizes = [2, 32], strides = [1, 1]} : vector<2x128xf32> to vector<2x32xf32>
    %21 = arith.mulf %20, %20 : vector<2x32xf32>
    %cst_17 = arith.constant dense<0.000000e+00> : vector<2xf32>
    %22 = vector.multi_reduction <add>, %21, %cst_17 [1] : vector<2x32xf32> to vector<2xf32>
    %23 = vector.shape_cast %22 : vector<2xf32> to vector<2x1xf32>
    %c0_18 = arith.constant 0 : index
    %c0_19 = arith.constant 0 : index
    %24 = vector.load %arg8[%c0_18, %c0_19] : memref<32x16xf32, #tpu.memory_space<vmem>>, vector<32x16xf32>
    %cst_20 = arith.constant dense<0.000000e+00> : vector<2x16xf32>
    %25 = tpu.matmul %20, %24, %cst_20 {dimension_numbers = #tpu.dot_dimension_numbers<[1], [0], [0], [1], [0, 0, 1, 1], [], []>} : vector<2x32xf32>, vector<32x16xf32>, vector<2x16xf32> -> vector<2x16xf32>
    %cst_21 = arith.constant 2.000000e+00 : f32
    %26 = vector.broadcast %cst_21 : f32 to vector<2x16xf32>
    %27 = arith.mulf %26, %25 : vector<2x16xf32>
    %28 = vector.broadcast %23 : vector<2x1xf32> to vector<2x16xf32>
    %29 = arith.subf %28, %27 : vector<2x16xf32>
    %c0_22 = arith.constant 0 : index
    %c0_23 = arith.constant 0 : index
    %30 = vector.load %arg9[%c0_22, %c0_23] : memref<1x16xf32, #tpu.memory_space<vmem>>, vector<1x16xf32>
    %31 = vector.broadcast %30 : vector<1x16xf32> to vector<2x16xf32>
    %32 = arith.addf %29, %31 : vector<2x16xf32>
    %cst_24 = arith.constant dense<0x7F800000> : vector<2xf32>
    %33 = vector.multi_reduction <minimumf>, %32, %cst_24 [1] : vector<2x16xf32> to vector<2xf32>
    %34 = vector.shape_cast %33 : vector<2xf32> to vector<2x1xf32>
    %35 = tpu.iota {dimensions = array<i32: 1>} : vector<2x16xi32>
    %36 = vector.broadcast %34 : vector<2x1xf32> to vector<2x16xf32>
    %37 = arith.cmpf ole, %32, %36 : vector<2x16xf32>
    %c16_i32 = arith.constant 16 : i32
    %38 = vector.broadcast %c16_i32 : i32 to vector<2x16xi32>
    %39 = arith.select %37, %35, %38 : vector<2x16xi1>, vector<2x16xi32>
    %cst_25 = arith.constant dense<2147483647> : vector<2xi32>
    %40 = vector.multi_reduction <minsi>, %39, %cst_25 [1] : vector<2x16xi32> to vector<2xi32>
    %41 = vector.shape_cast %40 : vector<2xi32> to vector<2x1xi32>
    %cst_26 = arith.constant 0.000000e+00 : f32
    %42 = vector.broadcast %cst_26 : f32 to vector<2x1xf32>
    %43 = arith.maximumf %34, %42 : vector<2x1xf32>
    %44 = vector.extract_strided_slice %19 {offsets = [0, 32], sizes = [2, 32], strides = [1, 1]} : vector<2x128xf32> to vector<2x32xf32>
    %45 = arith.mulf %44, %44 : vector<2x32xf32>
    %cst_27 = arith.constant dense<0.000000e+00> : vector<2xf32>
    %46 = vector.multi_reduction <add>, %45, %cst_27 [1] : vector<2x32xf32> to vector<2xf32>
    %47 = vector.shape_cast %46 : vector<2xf32> to vector<2x1xf32>
    %c0_28 = arith.constant 0 : index
    %c0_29 = arith.constant 0 : index
    %48 = vector.load %arg8[%c0_28, %c0_29] : memref<32x16xf32, #tpu.memory_space<vmem>>, vector<32x16xf32>
    %cst_30 = arith.constant dense<0.000000e+00> : vector<2x16xf32>
    %49 = tpu.matmul %44, %48, %cst_30 {dimension_numbers = #tpu.dot_dimension_numbers<[1], [0], [0], [1], [0, 0, 1, 1], [], []>} : vector<2x32xf32>, vector<32x16xf32>, vector<2x16xf32> -> vector<2x16xf32>
    %cst_31 = arith.constant 2.000000e+00 : f32
    %50 = vector.broadcast %cst_31 : f32 to vector<2x16xf32>
    %51 = arith.mulf %50, %49 : vector<2x16xf32>
    %52 = vector.broadcast %47 : vector<2x1xf32> to vector<2x16xf32>
    %53 = arith.subf %52, %51 : vector<2x16xf32>
    %c0_32 = arith.constant 0 : index
    %c0_33 = arith.constant 0 : index
    %54 = vector.load %arg9[%c0_32, %c0_33] : memref<1x16xf32, #tpu.memory_space<vmem>>, vector<1x16xf32>
    %55 = vector.broadcast %54 : vector<1x16xf32> to vector<2x16xf32>
    %56 = arith.addf %53, %55 : vector<2x16xf32>
    %cst_34 = arith.constant dense<0x7F800000> : vector<2xf32>
    %57 = vector.multi_reduction <minimumf>, %56, %cst_34 [1] : vector<2x16xf32> to vector<2xf32>
    %58 = vector.shape_cast %57 : vector<2xf32> to vector<2x1xf32>
    %59 = tpu.iota {dimensions = array<i32: 1>} : vector<2x16xi32>
    %60 = vector.broadcast %58 : vector<2x1xf32> to vector<2x16xf32>
    %61 = arith.cmpf ole, %56, %60 : vector<2x16xf32>
    %c16_i32_35 = arith.constant 16 : i32
    %62 = vector.broadcast %c16_i32_35 : i32 to vector<2x16xi32>
    %63 = arith.select %61, %59, %62 : vector<2x16xi1>, vector<2x16xi32>
    %cst_36 = arith.constant dense<2147483647> : vector<2xi32>
    %64 = vector.multi_reduction <minsi>, %63, %cst_36 [1] : vector<2x16xi32> to vector<2xi32>
    %65 = vector.shape_cast %64 : vector<2xi32> to vector<2x1xi32>
    %cst_37 = arith.constant 0.000000e+00 : f32
    %66 = vector.broadcast %cst_37 : f32 to vector<2x1xf32>
    %67 = arith.maximumf %58, %66 : vector<2x1xf32>
    %68 = vector.extract_strided_slice %19 {offsets = [0, 64], sizes = [2, 32], strides = [1, 1]} : vector<2x128xf32> to vector<2x32xf32>
    %69 = arith.mulf %68, %68 : vector<2x32xf32>
    %cst_38 = arith.constant dense<0.000000e+00> : vector<2xf32>
    %70 = vector.multi_reduction <add>, %69, %cst_38 [1] : vector<2x32xf32> to vector<2xf32>
    %71 = vector.shape_cast %70 : vector<2xf32> to vector<2x1xf32>
    %c0_39 = arith.constant 0 : index
    %c0_40 = arith.constant 0 : index
    %72 = vector.load %arg8[%c0_39, %c0_40] : memref<32x16xf32, #tpu.memory_space<vmem>>, vector<32x16xf32>
    %cst_41 = arith.constant dense<0.000000e+00> : vector<2x16xf32>
    %73 = tpu.matmul %68, %72, %cst_41 {dimension_numbers = #tpu.dot_dimension_numbers<[1], [0], [0], [1], [0, 0, 1, 1], [], []>} : vector<2x32xf32>, vector<32x16xf32>, vector<2x16xf32> -> vector<2x16xf32>
    %cst_42 = arith.constant 2.000000e+00 : f32
    %74 = vector.broadcast %cst_42 : f32 to vector<2x16xf32>
    %75 = arith.mulf %74, %73 : vector<2x16xf32>
    %76 = vector.broadcast %71 : vector<2x1xf32> to vector<2x16xf32>
    %77 = arith.subf %76, %75 : vector<2x16xf32>
    %c0_43 = arith.constant 0 : index
    %c0_44 = arith.constant 0 : index
    %78 = vector.load %arg9[%c0_43, %c0_44] : memref<1x16xf32, #tpu.memory_space<vmem>>, vector<1x16xf32>
    %79 = vector.broadcast %78 : vector<1x16xf32> to vector<2x16xf32>
    %80 = arith.addf %77, %79 : vector<2x16xf32>
    %cst_45 = arith.constant dense<0x7F800000> : vector<2xf32>
    %81 = vector.multi_reduction <minimumf>, %80, %cst_45 [1] : vector<2x16xf32> to vector<2xf32>
    %82 = vector.shape_cast %81 : vector<2xf32> to vector<2x1xf32>
    %83 = tpu.iota {dimensions = array<i32: 1>} : vector<2x16xi32>
    %84 = vector.broadcast %82 : vector<2x1xf32> to vector<2x16xf32>
    %85 = arith.cmpf ole, %80, %84 : vector<2x16xf32>
    %c16_i32_46 = arith.constant 16 : i32
    %86 = vector.broadcast %c16_i32_46 : i32 to vector<2x16xi32>
    %87 = arith.select %85, %83, %86 : vector<2x16xi1>, vector<2x16xi32>
    %cst_47 = arith.constant dense<2147483647> : vector<2xi32>
    %88 = vector.multi_reduction <minsi>, %87, %cst_47 [1] : vector<2x16xi32> to vector<2xi32>
    %89 = vector.shape_cast %88 : vector<2xi32> to vector<2x1xi32>
    %cst_48 = arith.constant 0.000000e+00 : f32
    %90 = vector.broadcast %cst_48 : f32 to vector<2x1xf32>
    %91 = arith.maximumf %82, %90 : vector<2x1xf32>
    %92 = vector.extract_strided_slice %19 {offsets = [0, 96], sizes = [2, 32], strides = [1, 1]} : vector<2x128xf32> to vector<2x32xf32>
    %93 = arith.mulf %92, %92 : vector<2x32xf32>
    %cst_49 = arith.constant dense<0.000000e+00> : vector<2xf32>
    %94 = vector.multi_reduction <add>, %93, %cst_49 [1] : vector<2x32xf32> to vector<2xf32>
    %95 = vector.shape_cast %94 : vector<2xf32> to vector<2x1xf32>
    %c0_50 = arith.constant 0 : index
    %c0_51 = arith.constant 0 : index
    %96 = vector.load %arg8[%c0_50, %c0_51] : memref<32x16xf32, #tpu.memory_space<vmem>>, vector<32x16xf32>
    %cst_52 = arith.constant dense<0.000000e+00> : vector<2x16xf32>
    %97 = tpu.matmul %92, %96, %cst_52 {dimension_numbers = #tpu.dot_dimension_numbers<[1], [0], [0], [1], [0, 0, 1, 1], [], []>} : vector<2x32xf32>, vector<32x16xf32>, vector<2x16xf32> -> vector<2x16xf32>
    %cst_53 = arith.constant 2.000000e+00 : f32
    %98 = vector.broadcast %cst_53 : f32 to vector<2x16xf32>
    %99 = arith.mulf %98, %97 : vector<2x16xf32>
    %100 = vector.broadcast %95 : vector<2x1xf32> to vector<2x16xf32>
    %101 = arith.subf %100, %99 : vector<2x16xf32>
    %c0_54 = arith.constant 0 : index
    %c0_55 = arith.constant 0 : index
    %102 = vector.load %arg9[%c0_54, %c0_55] : memref<1x16xf32, #tpu.memory_space<vmem>>, vector<1x16xf32>
    %103 = vector.broadcast %102 : vector<1x16xf32> to vector<2x16xf32>
    %104 = arith.addf %101, %103 : vector<2x16xf32>
    %cst_56 = arith.constant dense<0x7F800000> : vector<2xf32>
    %105 = vector.multi_reduction <minimumf>, %104, %cst_56 [1] : vector<2x16xf32> to vector<2xf32>
    %106 = vector.shape_cast %105 : vector<2xf32> to vector<2x1xf32>
    %107 = tpu.iota {dimensions = array<i32: 1>} : vector<2x16xi32>
    %108 = vector.broadcast %106 : vector<2x1xf32> to vector<2x16xf32>
    %109 = arith.cmpf ole, %104, %108 : vector<2x16xf32>
    %c16_i32_57 = arith.constant 16 : i32
    %110 = vector.broadcast %c16_i32_57 : i32 to vector<2x16xi32>
    %111 = arith.select %109, %107, %110 : vector<2x16xi1>, vector<2x16xi32>
    %cst_58 = arith.constant dense<2147483647> : vector<2xi32>
    %112 = vector.multi_reduction <minsi>, %111, %cst_58 [1] : vector<2x16xi32> to vector<2xi32>
    %113 = vector.shape_cast %112 : vector<2xi32> to vector<2x1xi32>
    %cst_59 = arith.constant 0.000000e+00 : f32
    %114 = vector.broadcast %cst_59 : f32 to vector<2x1xf32>
    %115 = arith.maximumf %106, %114 : vector<2x1xf32>
    %116 = tpu.concatenate %41, %65, %89, %113 in 1 : vector<2x1xi32>, vector<2x1xi32>, vector<2x1xi32>, vector<2x1xi32> -> vector<2x4xi32>
    %c0_60 = arith.constant 0 : index
    %c0_61 = arith.constant 0 : index
    %117 = vector.load %arg10[%c0_60, %c0_61] : memref<2x4xi32, #tpu.memory_space<vmem>>, vector<2x4xi32>
    tpu.vector_store %arg10[%c0_60, %c0_61], %116 {strides = array<i32>} : memref<2x4xi32, #tpu.memory_space<vmem>>, vector<2x4xi32>,
    %118 = tpu.concatenate %43, %67, %91, %115 in 1 : vector<2x1xf32>, vector<2x1xf32>, vector<2x1xf32>, vector<2x1xf32> -> vector<2x4xf32>
    %119 = vector.shape_cast %118 : vector<2x4xf32> to vector<1x2x4xf32>
    %cst_62 = arith.constant dense<0.000000e+00> : vector<1xf32>
    %120 = vector.multi_reduction <add>, %119, %cst_62 [1, 2] : vector<1x2x4xf32> to vector<1xf32>
    %121 = vector.shape_cast %120 : vector<1xf32> to vector<1x1x1xf32>
    %122 = vector.extract %121[0, 0, 0] : f32 from vector<1x1x1xf32>
    %cst_63 = arith.constant 8.000000e+00 : f32
    %123 = arith.divf %122, %cst_63 : f32
    %cst_64 = arith.constant 3.200000e+01 : f32
    %124 = arith.divf %123, %cst_64 : f32
    %cst_65 = arith.constant 1.250000e+00 : f32
    %125 = arith.mulf %cst_65, %124 : f32
    %126 = vector.broadcast %125 : f32 to vector<1x1xf32>
    %c0_66 = arith.constant 0 : index
    %c0_67 = arith.constant 0 : index
    %127 = vector.load %arg11[%c0_66, %c0_67] : memref<1x1xf32, #tpu.memory_space<vmem>>, vector<1x1xf32>
    tpu.vector_store %arg11[%c0_66, %c0_67], %126 {strides = array<i32>} : memref<1x1xf32, #tpu.memory_space<vmem>>, vector<1x1xf32>,
    return
  }
  func.func @transform_0(%arg0: i32) -> (i32, i32) {
    %c0_i32 = arith.constant 0 : i32
    %c0_i32_0 = arith.constant 0 : i32
    %c0_i32_1 = arith.constant 0 : i32
    return %c0_i32, %c0_i32_0 : i32, i32
  }
  func.func @transform_1(%arg0: i32) -> (i32, i32) {
    %c0_i32 = arith.constant 0 : i32
    %c0_i32_0 = arith.constant 0 : i32
    %c0_i32_1 = arith.constant 0 : i32
    return %c0_i32, %c0_i32_0 : i32, i32
  }
  func.func @transform_2(%arg0: i32) -> (i32, i32) {
    %c0_i32 = arith.constant 0 : i32
    %c0_i32_0 = arith.constant 0 : i32
    %c0_i32_1 = arith.constant 0 : i32
    return %c0_i32, %c0_i32_0 : i32, i32
  }
  func.func @transform_3(%arg0: i32) -> (i32, i32) {
    %c0_i32 = arith.constant 0 : i32
    %c0_i32_0 = arith.constant 0 : i32
    %c0_i32_1 = arith.constant 0 : i32
    return %c0_i32, %c0_i32_0 : i32, i32
  }
  func.func @transform_4(%arg0: i32) -> (i32, i32) {
    %c0_i32 = arith.constant 0 : i32
    %c0_i32_0 = arith.constant 0 : i32
    %c0_i32_1 = arith.constant 0 : i32
    return %c0_i32, %c0_i32_0 : i32, i32
  }
  func.func @transform_5(%arg0: i32) -> (i32, i32) {
    %c0_i32 = arith.constant 0 : i32
    %c0_i32_0 = arith.constant 0 : i32
    %c0_i32_1 = arith.constant 0 : i32
    return %c0_i32, %c0_i32_0 : i32, i32
  }
  func.func @transform_6(%arg0: i32) -> (i32, i32) {
    %c0_i32 = arith.constant 0 : i32
    %c0_i32_0 = arith.constant 0 : i32
    %c0_i32_1 = arith.constant 0 : i32
    return %c0_i32, %c0_i32_0 : i32, i32
  }
  func.func @transform_7(%arg0: i32) -> (i32, i32) {
    %c0_i32 = arith.constant 0 : i32
    %c0_i32_0 = arith.constant 0 : i32
    %c0_i32_1 = arith.constant 0 : i32
    return %c0_i32, %c0_i32_0 : i32, i32
  }
  func.func @transform_8(%arg0: i32) -> (i32, i32) {
    %c0_i32 = arith.constant 0 : i32
    %c0_i32_0 = arith.constant 0 : i32
    %c0_i32_1 = arith.constant 0 : i32
    return %c0_i32, %c0_i32_0 : i32, i32
  }
  func.func @transform_9(%arg0: i32) -> (i32, i32) {
    %c0_i32 = arith.constant 0 : i32
    %c0_i32_0 = arith.constant 0 : i32
    %c0_i32_1 = arith.constant 0 : i32
    return %c0_i32, %c0_i32_0 : i32, i32
  }
  func.func @transform_10(%arg0: i32) -> (i32, i32) {
    %c0_i32 = arith.constant 0 : i32
    %c0_i32_0 = arith.constant 0 : i32
    %c0_i32_1 = arith.constant 0 : i32
    return %c0_i32, %c0_i32_0 : i32, i32
  }
}

module attributes {stable_mosaic.version = 11 : i64} {
  func.func @_bert_kernel(%arg0: i32, %arg1: memref<12x32xf32, #tpu.memory_space<vmem>>, %arg2: memref<1x32xf32, #tpu.memory_space<vmem>>, %arg3: memref<1x32xf32, #tpu.memory_space<vmem>>, %arg4: memref<1x32x96xf32, #tpu.memory_space<vmem>>, %arg5: memref<1x1x96xf32, #tpu.memory_space<vmem>>, %arg6: memref<1x32x32xf32, #tpu.memory_space<vmem>>, %arg7: memref<1x1x32xf32, #tpu.memory_space<vmem>>, %arg8: memref<1x1x32xf32, #tpu.memory_space<vmem>>, %arg9: memref<1x1x32xf32, #tpu.memory_space<vmem>>, %arg10: memref<1x32x128xf32, #tpu.memory_space<vmem>>, %arg11: memref<1x1x128xf32, #tpu.memory_space<vmem>>, %arg12: memref<1x128x32xf32, #tpu.memory_space<vmem>>, %arg13: memref<1x1x32xf32, #tpu.memory_space<vmem>>, %arg14: memref<1x1x32xf32, #tpu.memory_space<vmem>>, %arg15: memref<1x1x32xf32, #tpu.memory_space<vmem>>, %arg16: memref<32x32xf32, #tpu.memory_space<vmem>>, %arg17: memref<1x32xf32, #tpu.memory_space<vmem>>, %arg18: memref<12x32xf32, #tpu.memory_space<vmem>>, %arg19: memref<2x32xf32, #tpu.memory_space<vmem>>, %arg20: memref<12x32xf32, #tpu.memory_space<vmem>>) attributes {dimension_semantics = [#tpu.dimension_semantics<arbitrary>], iteration_bounds = array<i64: 2>, scalar_prefetch = 0 : i64, scratch_operands = 1 : i64, tpu.core_type = #tpu.core_type<tc>, window_params = [{pipeline_mode = #tpu.pipeline_mode<synchronous>, transform_indices = @transform_0, window_bounds = array<i64: 12, 32>}, {pipeline_mode = #tpu.pipeline_mode<synchronous>, transform_indices = @transform_1, window_bounds = array<i64: 1, 32>}, {pipeline_mode = #tpu.pipeline_mode<synchronous>, transform_indices = @transform_2, window_bounds = array<i64: 1, 32>}, {transform_indices = @transform_3, window_bounds = array<i64: 1, 32, 96>}, {transform_indices = @transform_4, window_bounds = array<i64: 1, 1, 96>}, {transform_indices = @transform_5, window_bounds = array<i64: 1, 32, 32>}, {transform_indices = @transform_6, window_bounds = array<i64: 1, 1, 32>}, {transform_indices = @transform_7, window_bounds = array<i64: 1, 1, 32>}, {transform_indices = @transform_8, window_bounds = array<i64: 1, 1, 32>}, {transform_indices = @transform_9, window_bounds = array<i64: 1, 32, 128>}, {transform_indices = @transform_10, window_bounds = array<i64: 1, 1, 128>}, {transform_indices = @transform_11, window_bounds = array<i64: 1, 128, 32>}, {transform_indices = @transform_12, window_bounds = array<i64: 1, 1, 32>}, {transform_indices = @transform_13, window_bounds = array<i64: 1, 1, 32>}, {transform_indices = @transform_14, window_bounds = array<i64: 1, 1, 32>}, {pipeline_mode = #tpu.pipeline_mode<synchronous>, transform_indices = @transform_15, window_bounds = array<i64: 32, 32>}, {pipeline_mode = #tpu.pipeline_mode<synchronous>, transform_indices = @transform_16, window_bounds = array<i64: 1, 32>}, {pipeline_mode = #tpu.pipeline_mode<synchronous>, transform_indices = @transform_17, window_bounds = array<i64: 12, 32>}, {pipeline_mode = #tpu.pipeline_mode<synchronous>, transform_indices = @transform_18, window_bounds = array<i64: 2, 32>}]} {
    %c0_i32 = arith.constant 0 : i32
    %0 = arith.cmpi eq, %arg0, %c0_i32 : i32
    %1 = arith.extui %0 : i1 to i32
    %c0_i32_0 = arith.constant 0 : i32
    %2 = arith.cmpi ne, %1, %c0_i32_0 : i32
    scf.if %2 {
      %c0_98 = arith.constant 0 : index
      %c0_99 = arith.constant 0 : index
      %250 = vector.load %arg1[%c0_98, %c0_99] : memref<12x32xf32, #tpu.memory_space<vmem>>, vector<12x32xf32>
      %c0_100 = arith.constant 0 : index
      %c0_101 = arith.constant 0 : index
      %251 = vector.load %arg2[%c0_100, %c0_101] : memref<1x32xf32, #tpu.memory_space<vmem>>, vector<1x32xf32>
      %c0_102 = arith.constant 0 : index
      %c0_103 = arith.constant 0 : index
      %252 = vector.load %arg3[%c0_102, %c0_103] : memref<1x32xf32, #tpu.memory_space<vmem>>, vector<1x32xf32>
      %cst_104 = arith.constant dense<0.000000e+00> : vector<12xf32>
      %253 = vector.multi_reduction <add>, %250, %cst_104 [1] : vector<12x32xf32> to vector<12xf32>
      %254 = vector.shape_cast %253 : vector<12xf32> to vector<12x1xf32>
      %cst_105 = arith.constant 3.200000e+01 : f32
      %255 = vector.broadcast %cst_105 : f32 to vector<12x1xf32>
      %256 = arith.divf %254, %255 : vector<12x1xf32>
      %257 = vector.broadcast %256 : vector<12x1xf32> to vector<12x32xf32>
      %258 = arith.subf %250, %257 : vector<12x32xf32>
      %259 = arith.mulf %258, %258 : vector<12x32xf32>
      %cst_106 = arith.constant dense<0.000000e+00> : vector<12xf32>
      %260 = vector.multi_reduction <add>, %259, %cst_106 [1] : vector<12x32xf32> to vector<12xf32>
      %261 = vector.shape_cast %260 : vector<12xf32> to vector<12x1xf32>
      %cst_107 = arith.constant 3.200000e+01 : f32
      %262 = vector.broadcast %cst_107 : f32 to vector<12x1xf32>
      %263 = arith.divf %261, %262 : vector<12x1xf32>
      %264 = vector.broadcast %256 : vector<12x1xf32> to vector<12x32xf32>
      %265 = arith.subf %250, %264 : vector<12x32xf32>
      %cst_108 = arith.constant 9.99999996E-13 : f32
      %266 = vector.broadcast %cst_108 : f32 to vector<12x1xf32>
      %267 = arith.addf %263, %266 : vector<12x1xf32>
      %268 = math.rsqrt %267 : vector<12x1xf32>
      %269 = vector.broadcast %268 : vector<12x1xf32> to vector<12x32xf32>
      %270 = arith.mulf %265, %269 : vector<12x32xf32>
      %271 = vector.broadcast %251 : vector<1x32xf32> to vector<12x32xf32>
      %272 = arith.mulf %270, %271 : vector<12x32xf32>
      %273 = vector.broadcast %252 : vector<1x32xf32> to vector<12x32xf32>
      %274 = arith.addf %272, %273 : vector<12x32xf32>
      %c0_109 = arith.constant 0 : index
      %c0_110 = arith.constant 0 : index
      %275 = vector.load %arg20[%c0_109, %c0_110] : memref<12x32xf32, #tpu.memory_space<vmem>>, vector<12x32xf32>
      tpu.vector_store %arg20[%c0_109, %c0_110], %274 {strides = array<i32>} : memref<12x32xf32, #tpu.memory_space<vmem>>, vector<12x32xf32>,
    } else {
    }
    %c0 = arith.constant 0 : index
    %c0_1 = arith.constant 0 : index
    %3 = vector.load %arg20[%c0, %c0_1] : memref<12x32xf32, #tpu.memory_space<vmem>>, vector<12x32xf32>
    %c0_2 = arith.constant 0 : index
    %c0_3 = arith.constant 0 : index
    %c0_4 = arith.constant 0 : index
    %4 = vector.load %arg4[%c0_2, %c0_3, %c0_4] : memref<1x32x96xf32, #tpu.memory_space<vmem>>, vector<1x32x96xf32>
    %5 = vector.shape_cast %4 : vector<1x32x96xf32> to vector<32x96xf32>
    %cst = arith.constant dense<0.000000e+00> : vector<12x96xf32>
    %6 = tpu.matmul %3, %5, %cst {dimension_numbers = #tpu.dot_dimension_numbers<[1], [0], [0], [1], [0, 0, 1, 1], [], []>} : vector<12x32xf32>, vector<32x96xf32>, vector<12x96xf32> -> vector<12x96xf32>
    %c0_5 = arith.constant 0 : index
    %c0_6 = arith.constant 0 : index
    %c0_7 = arith.constant 0 : index
    %7 = vector.load %arg5[%c0_5, %c0_6, %c0_7] : memref<1x1x96xf32, #tpu.memory_space<vmem>>, vector<1x1x96xf32>
    %8 = vector.shape_cast %7 : vector<1x1x96xf32> to vector<1x96xf32>
    %9 = vector.broadcast %8 : vector<1x96xf32> to vector<12x96xf32>
    %10 = arith.addf %6, %9 : vector<12x96xf32>
    %11 = vector.extract_strided_slice %10 {offsets = [0, 0], sizes = [6, 8], strides = [1, 1]} : vector<12x96xf32> to vector<6x8xf32>
    %12 = vector.extract_strided_slice %10 {offsets = [0, 32], sizes = [6, 8], strides = [1, 1]} : vector<12x96xf32> to vector<6x8xf32>
    %13 = vector.extract_strided_slice %10 {offsets = [0, 64], sizes = [6, 8], strides = [1, 1]} : vector<12x96xf32> to vector<6x8xf32>
    %14 = tpu.transpose %12, [1, 0] : vector<6x8xf32> -> vector<8x6xf32>
    %cst_8 = arith.constant dense<0.000000e+00> : vector<6x6xf32>
    %15 = tpu.matmul %11, %14, %cst_8 {dimension_numbers = #tpu.dot_dimension_numbers<[1], [0], [0], [1], [0, 0, 1, 1], [], []>} : vector<6x8xf32>, vector<8x6xf32>, vector<6x6xf32> -> vector<6x6xf32>
    %cst_9 = arith.constant 0.353553385 : f32
    %16 = vector.broadcast %cst_9 : f32 to vector<6x6xf32>
    %17 = arith.mulf %15, %16 : vector<6x6xf32>
    %cst_10 = arith.constant dense<0xFF800000> : vector<6xf32>
    %18 = vector.multi_reduction <maximumf>, %17, %cst_10 [1] : vector<6x6xf32> to vector<6xf32>
    %19 = vector.shape_cast %18 : vector<6xf32> to vector<6x1xf32>
    %20 = vector.broadcast %19 : vector<6x1xf32> to vector<6x6xf32>
    %21 = arith.subf %17, %20 : vector<6x6xf32>
    %22 = math.exp %21 : vector<6x6xf32>
    %cst_11 = arith.constant dense<0.000000e+00> : vector<6xf32>
    %23 = vector.multi_reduction <add>, %22, %cst_11 [1] : vector<6x6xf32> to vector<6xf32>
    %24 = vector.shape_cast %23 : vector<6xf32> to vector<6x1xf32>
    %25 = tpu.reciprocal %24 {approx = true} : vector<6x1xf32> -> vector<6x1xf32>
    %26 = vector.broadcast %25 : vector<6x1xf32> to vector<6x6xf32>
    %27 = arith.mulf %22, %26 : vector<6x6xf32>
    %cst_12 = arith.constant dense<0.000000e+00> : vector<6x8xf32>
    %28 = tpu.matmul %27, %13, %cst_12 {dimension_numbers = #tpu.dot_dimension_numbers<[1], [0], [0], [1], [0, 0, 1, 1], [], []>} : vector<6x6xf32>, vector<6x8xf32>, vector<6x8xf32> -> vector<6x8xf32>
    %29 = vector.extract_strided_slice %10 {offsets = [0, 8], sizes = [6, 8], strides = [1, 1]} : vector<12x96xf32> to vector<6x8xf32>
    %30 = vector.extract_strided_slice %10 {offsets = [0, 40], sizes = [6, 8], strides = [1, 1]} : vector<12x96xf32> to vector<6x8xf32>
    %31 = vector.extract_strided_slice %10 {offsets = [0, 72], sizes = [6, 8], strides = [1, 1]} : vector<12x96xf32> to vector<6x8xf32>
    %32 = tpu.transpose %30, [1, 0] : vector<6x8xf32> -> vector<8x6xf32>
    %cst_13 = arith.constant dense<0.000000e+00> : vector<6x6xf32>
    %33 = tpu.matmul %29, %32, %cst_13 {dimension_numbers = #tpu.dot_dimension_numbers<[1], [0], [0], [1], [0, 0, 1, 1], [], []>} : vector<6x8xf32>, vector<8x6xf32>, vector<6x6xf32> -> vector<6x6xf32>
    %cst_14 = arith.constant 0.353553385 : f32
    %34 = vector.broadcast %cst_14 : f32 to vector<6x6xf32>
    %35 = arith.mulf %33, %34 : vector<6x6xf32>
    %cst_15 = arith.constant dense<0xFF800000> : vector<6xf32>
    %36 = vector.multi_reduction <maximumf>, %35, %cst_15 [1] : vector<6x6xf32> to vector<6xf32>
    %37 = vector.shape_cast %36 : vector<6xf32> to vector<6x1xf32>
    %38 = vector.broadcast %37 : vector<6x1xf32> to vector<6x6xf32>
    %39 = arith.subf %35, %38 : vector<6x6xf32>
    %40 = math.exp %39 : vector<6x6xf32>
    %cst_16 = arith.constant dense<0.000000e+00> : vector<6xf32>
    %41 = vector.multi_reduction <add>, %40, %cst_16 [1] : vector<6x6xf32> to vector<6xf32>
    %42 = vector.shape_cast %41 : vector<6xf32> to vector<6x1xf32>
    %43 = tpu.reciprocal %42 {approx = true} : vector<6x1xf32> -> vector<6x1xf32>
    %44 = vector.broadcast %43 : vector<6x1xf32> to vector<6x6xf32>
    %45 = arith.mulf %40, %44 : vector<6x6xf32>
    %cst_17 = arith.constant dense<0.000000e+00> : vector<6x8xf32>
    %46 = tpu.matmul %45, %31, %cst_17 {dimension_numbers = #tpu.dot_dimension_numbers<[1], [0], [0], [1], [0, 0, 1, 1], [], []>} : vector<6x6xf32>, vector<6x8xf32>, vector<6x8xf32> -> vector<6x8xf32>
    %47 = vector.extract_strided_slice %10 {offsets = [0, 16], sizes = [6, 8], strides = [1, 1]} : vector<12x96xf32> to vector<6x8xf32>
    %48 = vector.extract_strided_slice %10 {offsets = [0, 48], sizes = [6, 8], strides = [1, 1]} : vector<12x96xf32> to vector<6x8xf32>
    %49 = vector.extract_strided_slice %10 {offsets = [0, 80], sizes = [6, 8], strides = [1, 1]} : vector<12x96xf32> to vector<6x8xf32>
    %50 = tpu.transpose %48, [1, 0] : vector<6x8xf32> -> vector<8x6xf32>
    %cst_18 = arith.constant dense<0.000000e+00> : vector<6x6xf32>
    %51 = tpu.matmul %47, %50, %cst_18 {dimension_numbers = #tpu.dot_dimension_numbers<[1], [0], [0], [1], [0, 0, 1, 1], [], []>} : vector<6x8xf32>, vector<8x6xf32>, vector<6x6xf32> -> vector<6x6xf32>
    %cst_19 = arith.constant 0.353553385 : f32
    %52 = vector.broadcast %cst_19 : f32 to vector<6x6xf32>
    %53 = arith.mulf %51, %52 : vector<6x6xf32>
    %cst_20 = arith.constant dense<0xFF800000> : vector<6xf32>
    %54 = vector.multi_reduction <maximumf>, %53, %cst_20 [1] : vector<6x6xf32> to vector<6xf32>
    %55 = vector.shape_cast %54 : vector<6xf32> to vector<6x1xf32>
    %56 = vector.broadcast %55 : vector<6x1xf32> to vector<6x6xf32>
    %57 = arith.subf %53, %56 : vector<6x6xf32>
    %58 = math.exp %57 : vector<6x6xf32>
    %cst_21 = arith.constant dense<0.000000e+00> : vector<6xf32>
    %59 = vector.multi_reduction <add>, %58, %cst_21 [1] : vector<6x6xf32> to vector<6xf32>
    %60 = vector.shape_cast %59 : vector<6xf32> to vector<6x1xf32>
    %61 = tpu.reciprocal %60 {approx = true} : vector<6x1xf32> -> vector<6x1xf32>
    %62 = vector.broadcast %61 : vector<6x1xf32> to vector<6x6xf32>
    %63 = arith.mulf %58, %62 : vector<6x6xf32>
    %cst_22 = arith.constant dense<0.000000e+00> : vector<6x8xf32>
    %64 = tpu.matmul %63, %49, %cst_22 {dimension_numbers = #tpu.dot_dimension_numbers<[1], [0], [0], [1], [0, 0, 1, 1], [], []>} : vector<6x6xf32>, vector<6x8xf32>, vector<6x8xf32> -> vector<6x8xf32>
    %65 = vector.extract_strided_slice %10 {offsets = [0, 24], sizes = [6, 8], strides = [1, 1]} : vector<12x96xf32> to vector<6x8xf32>
    %66 = vector.extract_strided_slice %10 {offsets = [0, 56], sizes = [6, 8], strides = [1, 1]} : vector<12x96xf32> to vector<6x8xf32>
    %67 = vector.extract_strided_slice %10 {offsets = [0, 88], sizes = [6, 8], strides = [1, 1]} : vector<12x96xf32> to vector<6x8xf32>
    %68 = tpu.transpose %66, [1, 0] : vector<6x8xf32> -> vector<8x6xf32>
    %cst_23 = arith.constant dense<0.000000e+00> : vector<6x6xf32>
    %69 = tpu.matmul %65, %68, %cst_23 {dimension_numbers = #tpu.dot_dimension_numbers<[1], [0], [0], [1], [0, 0, 1, 1], [], []>} : vector<6x8xf32>, vector<8x6xf32>, vector<6x6xf32> -> vector<6x6xf32>
    %cst_24 = arith.constant 0.353553385 : f32
    %70 = vector.broadcast %cst_24 : f32 to vector<6x6xf32>
    %71 = arith.mulf %69, %70 : vector<6x6xf32>
    %cst_25 = arith.constant dense<0xFF800000> : vector<6xf32>
    %72 = vector.multi_reduction <maximumf>, %71, %cst_25 [1] : vector<6x6xf32> to vector<6xf32>
    %73 = vector.shape_cast %72 : vector<6xf32> to vector<6x1xf32>
    %74 = vector.broadcast %73 : vector<6x1xf32> to vector<6x6xf32>
    %75 = arith.subf %71, %74 : vector<6x6xf32>
    %76 = math.exp %75 : vector<6x6xf32>
    %cst_26 = arith.constant dense<0.000000e+00> : vector<6xf32>
    %77 = vector.multi_reduction <add>, %76, %cst_26 [1] : vector<6x6xf32> to vector<6xf32>
    %78 = vector.shape_cast %77 : vector<6xf32> to vector<6x1xf32>
    %79 = tpu.reciprocal %78 {approx = true} : vector<6x1xf32> -> vector<6x1xf32>
    %80 = vector.broadcast %79 : vector<6x1xf32> to vector<6x6xf32>
    %81 = arith.mulf %76, %80 : vector<6x6xf32>
    %cst_27 = arith.constant dense<0.000000e+00> : vector<6x8xf32>
    %82 = tpu.matmul %81, %67, %cst_27 {dimension_numbers = #tpu.dot_dimension_numbers<[1], [0], [0], [1], [0, 0, 1, 1], [], []>} : vector<6x6xf32>, vector<6x8xf32>, vector<6x8xf32> -> vector<6x8xf32>
    %83 = tpu.concatenate %28, %46, %64, %82 in 1 : vector<6x8xf32>, vector<6x8xf32>, vector<6x8xf32>, vector<6x8xf32> -> vector<6x32xf32>
    %84 = vector.extract_strided_slice %10 {offsets = [6, 0], sizes = [6, 8], strides = [1, 1]} : vector<12x96xf32> to vector<6x8xf32>
    %85 = vector.extract_strided_slice %10 {offsets = [6, 32], sizes = [6, 8], strides = [1, 1]} : vector<12x96xf32> to vector<6x8xf32>
    %86 = vector.extract_strided_slice %10 {offsets = [6, 64], sizes = [6, 8], strides = [1, 1]} : vector<12x96xf32> to vector<6x8xf32>
    %87 = tpu.transpose %85, [1, 0] : vector<6x8xf32> -> vector<8x6xf32>
    %cst_28 = arith.constant dense<0.000000e+00> : vector<6x6xf32>
    %88 = tpu.matmul %84, %87, %cst_28 {dimension_numbers = #tpu.dot_dimension_numbers<[1], [0], [0], [1], [0, 0, 1, 1], [], []>} : vector<6x8xf32>, vector<8x6xf32>, vector<6x6xf32> -> vector<6x6xf32>
    %cst_29 = arith.constant 0.353553385 : f32
    %89 = vector.broadcast %cst_29 : f32 to vector<6x6xf32>
    %90 = arith.mulf %88, %89 : vector<6x6xf32>
    %cst_30 = arith.constant dense<0xFF800000> : vector<6xf32>
    %91 = vector.multi_reduction <maximumf>, %90, %cst_30 [1] : vector<6x6xf32> to vector<6xf32>
    %92 = vector.shape_cast %91 : vector<6xf32> to vector<6x1xf32>
    %93 = vector.broadcast %92 : vector<6x1xf32> to vector<6x6xf32>
    %94 = arith.subf %90, %93 : vector<6x6xf32>
    %95 = math.exp %94 : vector<6x6xf32>
    %cst_31 = arith.constant dense<0.000000e+00> : vector<6xf32>
    %96 = vector.multi_reduction <add>, %95, %cst_31 [1] : vector<6x6xf32> to vector<6xf32>
    %97 = vector.shape_cast %96 : vector<6xf32> to vector<6x1xf32>
    %98 = tpu.reciprocal %97 {approx = true} : vector<6x1xf32> -> vector<6x1xf32>
    %99 = vector.broadcast %98 : vector<6x1xf32> to vector<6x6xf32>
    %100 = arith.mulf %95, %99 : vector<6x6xf32>
    %cst_32 = arith.constant dense<0.000000e+00> : vector<6x8xf32>
    %101 = tpu.matmul %100, %86, %cst_32 {dimension_numbers = #tpu.dot_dimension_numbers<[1], [0], [0], [1], [0, 0, 1, 1], [], []>} : vector<6x6xf32>, vector<6x8xf32>, vector<6x8xf32> -> vector<6x8xf32>
    %102 = vector.extract_strided_slice %10 {offsets = [6, 8], sizes = [6, 8], strides = [1, 1]} : vector<12x96xf32> to vector<6x8xf32>
    %103 = vector.extract_strided_slice %10 {offsets = [6, 40], sizes = [6, 8], strides = [1, 1]} : vector<12x96xf32> to vector<6x8xf32>
    %104 = vector.extract_strided_slice %10 {offsets = [6, 72], sizes = [6, 8], strides = [1, 1]} : vector<12x96xf32> to vector<6x8xf32>
    %105 = tpu.transpose %103, [1, 0] : vector<6x8xf32> -> vector<8x6xf32>
    %cst_33 = arith.constant dense<0.000000e+00> : vector<6x6xf32>
    %106 = tpu.matmul %102, %105, %cst_33 {dimension_numbers = #tpu.dot_dimension_numbers<[1], [0], [0], [1], [0, 0, 1, 1], [], []>} : vector<6x8xf32>, vector<8x6xf32>, vector<6x6xf32> -> vector<6x6xf32>
    %cst_34 = arith.constant 0.353553385 : f32
    %107 = vector.broadcast %cst_34 : f32 to vector<6x6xf32>
    %108 = arith.mulf %106, %107 : vector<6x6xf32>
    %cst_35 = arith.constant dense<0xFF800000> : vector<6xf32>
    %109 = vector.multi_reduction <maximumf>, %108, %cst_35 [1] : vector<6x6xf32> to vector<6xf32>
    %110 = vector.shape_cast %109 : vector<6xf32> to vector<6x1xf32>
    %111 = vector.broadcast %110 : vector<6x1xf32> to vector<6x6xf32>
    %112 = arith.subf %108, %111 : vector<6x6xf32>
    %113 = math.exp %112 : vector<6x6xf32>
    %cst_36 = arith.constant dense<0.000000e+00> : vector<6xf32>
    %114 = vector.multi_reduction <add>, %113, %cst_36 [1] : vector<6x6xf32> to vector<6xf32>
    %115 = vector.shape_cast %114 : vector<6xf32> to vector<6x1xf32>
    %116 = tpu.reciprocal %115 {approx = true} : vector<6x1xf32> -> vector<6x1xf32>
    %117 = vector.broadcast %116 : vector<6x1xf32> to vector<6x6xf32>
    %118 = arith.mulf %113, %117 : vector<6x6xf32>
    %cst_37 = arith.constant dense<0.000000e+00> : vector<6x8xf32>
    %119 = tpu.matmul %118, %104, %cst_37 {dimension_numbers = #tpu.dot_dimension_numbers<[1], [0], [0], [1], [0, 0, 1, 1], [], []>} : vector<6x6xf32>, vector<6x8xf32>, vector<6x8xf32> -> vector<6x8xf32>
    %120 = vector.extract_strided_slice %10 {offsets = [6, 16], sizes = [6, 8], strides = [1, 1]} : vector<12x96xf32> to vector<6x8xf32>
    %121 = vector.extract_strided_slice %10 {offsets = [6, 48], sizes = [6, 8], strides = [1, 1]} : vector<12x96xf32> to vector<6x8xf32>
    %122 = vector.extract_strided_slice %10 {offsets = [6, 80], sizes = [6, 8], strides = [1, 1]} : vector<12x96xf32> to vector<6x8xf32>
    %123 = tpu.transpose %121, [1, 0] : vector<6x8xf32> -> vector<8x6xf32>
    %cst_38 = arith.constant dense<0.000000e+00> : vector<6x6xf32>
    %124 = tpu.matmul %120, %123, %cst_38 {dimension_numbers = #tpu.dot_dimension_numbers<[1], [0], [0], [1], [0, 0, 1, 1], [], []>} : vector<6x8xf32>, vector<8x6xf32>, vector<6x6xf32> -> vector<6x6xf32>
    %cst_39 = arith.constant 0.353553385 : f32
    %125 = vector.broadcast %cst_39 : f32 to vector<6x6xf32>
    %126 = arith.mulf %124, %125 : vector<6x6xf32>
    %cst_40 = arith.constant dense<0xFF800000> : vector<6xf32>
    %127 = vector.multi_reduction <maximumf>, %126, %cst_40 [1] : vector<6x6xf32> to vector<6xf32>
    %128 = vector.shape_cast %127 : vector<6xf32> to vector<6x1xf32>
    %129 = vector.broadcast %128 : vector<6x1xf32> to vector<6x6xf32>
    %130 = arith.subf %126, %129 : vector<6x6xf32>
    %131 = math.exp %130 : vector<6x6xf32>
    %cst_41 = arith.constant dense<0.000000e+00> : vector<6xf32>
    %132 = vector.multi_reduction <add>, %131, %cst_41 [1] : vector<6x6xf32> to vector<6xf32>
    %133 = vector.shape_cast %132 : vector<6xf32> to vector<6x1xf32>
    %134 = tpu.reciprocal %133 {approx = true} : vector<6x1xf32> -> vector<6x1xf32>
    %135 = vector.broadcast %134 : vector<6x1xf32> to vector<6x6xf32>
    %136 = arith.mulf %131, %135 : vector<6x6xf32>
    %cst_42 = arith.constant dense<0.000000e+00> : vector<6x8xf32>
    %137 = tpu.matmul %136, %122, %cst_42 {dimension_numbers = #tpu.dot_dimension_numbers<[1], [0], [0], [1], [0, 0, 1, 1], [], []>} : vector<6x6xf32>, vector<6x8xf32>, vector<6x8xf32> -> vector<6x8xf32>
    %138 = vector.extract_strided_slice %10 {offsets = [6, 24], sizes = [6, 8], strides = [1, 1]} : vector<12x96xf32> to vector<6x8xf32>
    %139 = vector.extract_strided_slice %10 {offsets = [6, 56], sizes = [6, 8], strides = [1, 1]} : vector<12x96xf32> to vector<6x8xf32>
    %140 = vector.extract_strided_slice %10 {offsets = [6, 88], sizes = [6, 8], strides = [1, 1]} : vector<12x96xf32> to vector<6x8xf32>
    %141 = tpu.transpose %139, [1, 0] : vector<6x8xf32> -> vector<8x6xf32>
    %cst_43 = arith.constant dense<0.000000e+00> : vector<6x6xf32>
    %142 = tpu.matmul %138, %141, %cst_43 {dimension_numbers = #tpu.dot_dimension_numbers<[1], [0], [0], [1], [0, 0, 1, 1], [], []>} : vector<6x8xf32>, vector<8x6xf32>, vector<6x6xf32> -> vector<6x6xf32>
    %cst_44 = arith.constant 0.353553385 : f32
    %143 = vector.broadcast %cst_44 : f32 to vector<6x6xf32>
    %144 = arith.mulf %142, %143 : vector<6x6xf32>
    %cst_45 = arith.constant dense<0xFF800000> : vector<6xf32>
    %145 = vector.multi_reduction <maximumf>, %144, %cst_45 [1] : vector<6x6xf32> to vector<6xf32>
    %146 = vector.shape_cast %145 : vector<6xf32> to vector<6x1xf32>
    %147 = vector.broadcast %146 : vector<6x1xf32> to vector<6x6xf32>
    %148 = arith.subf %144, %147 : vector<6x6xf32>
    %149 = math.exp %148 : vector<6x6xf32>
    %cst_46 = arith.constant dense<0.000000e+00> : vector<6xf32>
    %150 = vector.multi_reduction <add>, %149, %cst_46 [1] : vector<6x6xf32> to vector<6xf32>
    %151 = vector.shape_cast %150 : vector<6xf32> to vector<6x1xf32>
    %152 = tpu.reciprocal %151 {approx = true} : vector<6x1xf32> -> vector<6x1xf32>
    %153 = vector.broadcast %152 : vector<6x1xf32> to vector<6x6xf32>
    %154 = arith.mulf %149, %153 : vector<6x6xf32>
    %cst_47 = arith.constant dense<0.000000e+00> : vector<6x8xf32>
    %155 = tpu.matmul %154, %140, %cst_47 {dimension_numbers = #tpu.dot_dimension_numbers<[1], [0], [0], [1], [0, 0, 1, 1], [], []>} : vector<6x6xf32>, vector<6x8xf32>, vector<6x8xf32> -> vector<6x8xf32>
    %156 = tpu.concatenate %101, %119, %137, %155 in 1 : vector<6x8xf32>, vector<6x8xf32>, vector<6x8xf32>, vector<6x8xf32> -> vector<6x32xf32>
    %157 = tpu.concatenate %83, %156 in 0 : vector<6x32xf32>, vector<6x32xf32> -> vector<12x32xf32>
    %c0_48 = arith.constant 0 : index
    %c0_49 = arith.constant 0 : index
    %c0_50 = arith.constant 0 : index
    %158 = vector.load %arg6[%c0_48, %c0_49, %c0_50] : memref<1x32x32xf32, #tpu.memory_space<vmem>>, vector<1x32x32xf32>
    %159 = vector.shape_cast %158 : vector<1x32x32xf32> to vector<32x32xf32>
    %cst_51 = arith.constant dense<0.000000e+00> : vector<12x32xf32>
    %160 = tpu.matmul %157, %159, %cst_51 {dimension_numbers = #tpu.dot_dimension_numbers<[1], [0], [0], [1], [0, 0, 1, 1], [], []>} : vector<12x32xf32>, vector<32x32xf32>, vector<12x32xf32> -> vector<12x32xf32>
    %c0_52 = arith.constant 0 : index
    %c0_53 = arith.constant 0 : index
    %c0_54 = arith.constant 0 : index
    %161 = vector.load %arg7[%c0_52, %c0_53, %c0_54] : memref<1x1x32xf32, #tpu.memory_space<vmem>>, vector<1x1x32xf32>
    %162 = vector.shape_cast %161 : vector<1x1x32xf32> to vector<1x32xf32>
    %163 = vector.broadcast %162 : vector<1x32xf32> to vector<12x32xf32>
    %164 = arith.addf %160, %163 : vector<12x32xf32>
    %165 = arith.addf %3, %164 : vector<12x32xf32>
    %c0_55 = arith.constant 0 : index
    %c0_56 = arith.constant 0 : index
    %c0_57 = arith.constant 0 : index
    %166 = vector.load %arg8[%c0_55, %c0_56, %c0_57] : memref<1x1x32xf32, #tpu.memory_space<vmem>>, vector<1x1x32xf32>
    %167 = vector.shape_cast %166 : vector<1x1x32xf32> to vector<1x32xf32>
    %c0_58 = arith.constant 0 : index
    %c0_59 = arith.constant 0 : index
    %c0_60 = arith.constant 0 : index
    %168 = vector.load %arg9[%c0_58, %c0_59, %c0_60] : memref<1x1x32xf32, #tpu.memory_space<vmem>>, vector<1x1x32xf32>
    %169 = vector.shape_cast %168 : vector<1x1x32xf32> to vector<1x32xf32>
    %cst_61 = arith.constant dense<0.000000e+00> : vector<12xf32>
    %170 = vector.multi_reduction <add>, %165, %cst_61 [1] : vector<12x32xf32> to vector<12xf32>
    %171 = vector.shape_cast %170 : vector<12xf32> to vector<12x1xf32>
    %cst_62 = arith.constant 3.200000e+01 : f32
    %172 = vector.broadcast %cst_62 : f32 to vector<12x1xf32>
    %173 = arith.divf %171, %172 : vector<12x1xf32>
    %174 = vector.broadcast %173 : vector<12x1xf32> to vector<12x32xf32>
    %175 = arith.subf %165, %174 : vector<12x32xf32>
    %176 = arith.mulf %175, %175 : vector<12x32xf32>
    %cst_63 = arith.constant dense<0.000000e+00> : vector<12xf32>
    %177 = vector.multi_reduction <add>, %176, %cst_63 [1] : vector<12x32xf32> to vector<12xf32>
    %178 = vector.shape_cast %177 : vector<12xf32> to vector<12x1xf32>
    %cst_64 = arith.constant 3.200000e+01 : f32
    %179 = vector.broadcast %cst_64 : f32 to vector<12x1xf32>
    %180 = arith.divf %178, %179 : vector<12x1xf32>
    %181 = vector.broadcast %173 : vector<12x1xf32> to vector<12x32xf32>
    %182 = arith.subf %165, %181 : vector<12x32xf32>
    %cst_65 = arith.constant 9.99999996E-13 : f32
    %183 = vector.broadcast %cst_65 : f32 to vector<12x1xf32>
    %184 = arith.addf %180, %183 : vector<12x1xf32>
    %185 = math.rsqrt %184 : vector<12x1xf32>
    %186 = vector.broadcast %185 : vector<12x1xf32> to vector<12x32xf32>
    %187 = arith.mulf %182, %186 : vector<12x32xf32>
    %188 = vector.broadcast %167 : vector<1x32xf32> to vector<12x32xf32>
    %189 = arith.mulf %187, %188 : vector<12x32xf32>
    %190 = vector.broadcast %169 : vector<1x32xf32> to vector<12x32xf32>
    %191 = arith.addf %189, %190 : vector<12x32xf32>
    %c0_66 = arith.constant 0 : index
    %c0_67 = arith.constant 0 : index
    %c0_68 = arith.constant 0 : index
    %192 = vector.load %arg10[%c0_66, %c0_67, %c0_68] : memref<1x32x128xf32, #tpu.memory_space<vmem>>, vector<1x32x128xf32>
    %193 = vector.shape_cast %192 : vector<1x32x128xf32> to vector<32x128xf32>
    %cst_69 = arith.constant dense<0.000000e+00> : vector<12x128xf32>
    %194 = tpu.matmul %191, %193, %cst_69 {dimension_numbers = #tpu.dot_dimension_numbers<[1], [0], [0], [1], [0, 0, 1, 1], [], []>} : vector<12x32xf32>, vector<32x128xf32>, vector<12x128xf32> -> vector<12x128xf32>
    %c0_70 = arith.constant 0 : index
    %c0_71 = arith.constant 0 : index
    %c0_72 = arith.constant 0 : index
    %195 = vector.load %arg11[%c0_70, %c0_71, %c0_72] : memref<1x1x128xf32, #tpu.memory_space<vmem>>, vector<1x1x128xf32>
    %196 = vector.shape_cast %195 : vector<1x1x128xf32> to vector<1x128xf32>
    %197 = vector.broadcast %196 : vector<1x128xf32> to vector<12x128xf32>
    %198 = arith.addf %194, %197 : vector<12x128xf32>
    %199 = arith.mulf %198, %198 : vector<12x128xf32>
    %200 = arith.mulf %198, %199 : vector<12x128xf32>
    %cst_73 = arith.constant 4.471500e-02 : f32
    %201 = vector.broadcast %cst_73 : f32 to vector<12x128xf32>
    %202 = arith.mulf %201, %200 : vector<12x128xf32>
    %203 = arith.addf %198, %202 : vector<12x128xf32>
    %cst_74 = arith.constant 0.797884583 : f32
    %204 = vector.broadcast %cst_74 : f32 to vector<12x128xf32>
    %205 = arith.mulf %204, %203 : vector<12x128xf32>
    %206 = math.tanh %205 : vector<12x128xf32>
    %cst_75 = arith.constant 1.000000e+00 : f32
    %207 = vector.broadcast %cst_75 : f32 to vector<12x128xf32>
    %208 = arith.addf %207, %206 : vector<12x128xf32>
    %cst_76 = arith.constant 5.000000e-01 : f32
    %209 = vector.broadcast %cst_76 : f32 to vector<12x128xf32>
    %210 = arith.mulf %209, %208 : vector<12x128xf32>
    %211 = arith.mulf %198, %210 : vector<12x128xf32>
    %c0_77 = arith.constant 0 : index
    %c0_78 = arith.constant 0 : index
    %c0_79 = arith.constant 0 : index
    %212 = vector.load %arg12[%c0_77, %c0_78, %c0_79] : memref<1x128x32xf32, #tpu.memory_space<vmem>>, vector<1x128x32xf32>
    %213 = vector.shape_cast %212 : vector<1x128x32xf32> to vector<128x32xf32>
    %cst_80 = arith.constant dense<0.000000e+00> : vector<12x32xf32>
    %214 = tpu.matmul %211, %213, %cst_80 {dimension_numbers = #tpu.dot_dimension_numbers<[1], [0], [0], [1], [0, 0, 1, 1], [], []>} : vector<12x128xf32>, vector<128x32xf32>, vector<12x32xf32> -> vector<12x32xf32>
    %c0_81 = arith.constant 0 : index
    %c0_82 = arith.constant 0 : index
    %c0_83 = arith.constant 0 : index
    %215 = vector.load %arg13[%c0_81, %c0_82, %c0_83] : memref<1x1x32xf32, #tpu.memory_space<vmem>>, vector<1x1x32xf32>
    %216 = vector.shape_cast %215 : vector<1x1x32xf32> to vector<1x32xf32>
    %217 = vector.broadcast %216 : vector<1x32xf32> to vector<12x32xf32>
    %218 = arith.addf %214, %217 : vector<12x32xf32>
    %219 = arith.addf %191, %218 : vector<12x32xf32>
    %c0_84 = arith.constant 0 : index
    %c0_85 = arith.constant 0 : index
    %c0_86 = arith.constant 0 : index
    %220 = vector.load %arg14[%c0_84, %c0_85, %c0_86] : memref<1x1x32xf32, #tpu.memory_space<vmem>>, vector<1x1x32xf32>
    %221 = vector.shape_cast %220 : vector<1x1x32xf32> to vector<1x32xf32>
    %c0_87 = arith.constant 0 : index
    %c0_88 = arith.constant 0 : index
    %c0_89 = arith.constant 0 : index
    %222 = vector.load %arg15[%c0_87, %c0_88, %c0_89] : memref<1x1x32xf32, #tpu.memory_space<vmem>>, vector<1x1x32xf32>
    %223 = vector.shape_cast %222 : vector<1x1x32xf32> to vector<1x32xf32>
    %cst_90 = arith.constant dense<0.000000e+00> : vector<12xf32>
    %224 = vector.multi_reduction <add>, %219, %cst_90 [1] : vector<12x32xf32> to vector<12xf32>
    %225 = vector.shape_cast %224 : vector<12xf32> to vector<12x1xf32>
    %cst_91 = arith.constant 3.200000e+01 : f32
    %226 = vector.broadcast %cst_91 : f32 to vector<12x1xf32>
    %227 = arith.divf %225, %226 : vector<12x1xf32>
    %228 = vector.broadcast %227 : vector<12x1xf32> to vector<12x32xf32>
    %229 = arith.subf %219, %228 : vector<12x32xf32>
    %230 = arith.mulf %229, %229 : vector<12x32xf32>
    %cst_92 = arith.constant dense<0.000000e+00> : vector<12xf32>
    %231 = vector.multi_reduction <add>, %230, %cst_92 [1] : vector<12x32xf32> to vector<12xf32>
    %232 = vector.shape_cast %231 : vector<12xf32> to vector<12x1xf32>
    %cst_93 = arith.constant 3.200000e+01 : f32
    %233 = vector.broadcast %cst_93 : f32 to vector<12x1xf32>
    %234 = arith.divf %232, %233 : vector<12x1xf32>
    %235 = vector.broadcast %227 : vector<12x1xf32> to vector<12x32xf32>
    %236 = arith.subf %219, %235 : vector<12x32xf32>
    %cst_94 = arith.constant 9.99999996E-13 : f32
    %237 = vector.broadcast %cst_94 : f32 to vector<12x1xf32>
    %238 = arith.addf %234, %237 : vector<12x1xf32>
    %239 = math.rsqrt %238 : vector<12x1xf32>
    %240 = vector.broadcast %239 : vector<12x1xf32> to vector<12x32xf32>
    %241 = arith.mulf %236, %240 : vector<12x32xf32>
    %242 = vector.broadcast %221 : vector<1x32xf32> to vector<12x32xf32>
    %243 = arith.mulf %241, %242 : vector<12x32xf32>
    %244 = vector.broadcast %223 : vector<1x32xf32> to vector<12x32xf32>
    %245 = arith.addf %243, %244 : vector<12x32xf32>
    %c0_95 = arith.constant 0 : index
    %c0_96 = arith.constant 0 : index
    %246 = vector.load %arg20[%c0_95, %c0_96] : memref<12x32xf32, #tpu.memory_space<vmem>>, vector<12x32xf32>
    tpu.vector_store %arg20[%c0_95, %c0_96], %245 {strides = array<i32>} : memref<12x32xf32, #tpu.memory_space<vmem>>, vector<12x32xf32>,
    %c1_i32 = arith.constant 1 : i32
    %247 = arith.cmpi eq, %arg0, %c1_i32 : i32
    %248 = arith.extui %247 : i1 to i32
    %c0_i32_97 = arith.constant 0 : i32
    %249 = arith.cmpi ne, %248, %c0_i32_97 : i32
    scf.if %249 {
      %c0_98 = arith.constant 0 : index
      %c0_99 = arith.constant 0 : index
      %250 = vector.load %arg18[%c0_98, %c0_99] : memref<12x32xf32, #tpu.memory_space<vmem>>, vector<12x32xf32>
      tpu.vector_store %arg18[%c0_98, %c0_99], %245 {strides = array<i32>} : memref<12x32xf32, #tpu.memory_space<vmem>>, vector<12x32xf32>,
      %251 = vector.extract_strided_slice %245 {offsets = [0, 0], sizes = [1, 32], strides = [1, 1]} : vector<12x32xf32> to vector<1x32xf32>
      %252 = vector.extract_strided_slice %245 {offsets = [6, 0], sizes = [1, 32], strides = [1, 1]} : vector<12x32xf32> to vector<1x32xf32>
      %253 = tpu.concatenate %251, %252 in 0 : vector<1x32xf32>, vector<1x32xf32> -> vector<2x32xf32>
      %c0_100 = arith.constant 0 : index
      %c0_101 = arith.constant 0 : index
      %254 = vector.load %arg16[%c0_100, %c0_101] : memref<32x32xf32, #tpu.memory_space<vmem>>, vector<32x32xf32>
      %cst_102 = arith.constant dense<0.000000e+00> : vector<2x32xf32>
      %255 = tpu.matmul %253, %254, %cst_102 {dimension_numbers = #tpu.dot_dimension_numbers<[1], [0], [0], [1], [0, 0, 1, 1], [], []>} : vector<2x32xf32>, vector<32x32xf32>, vector<2x32xf32> -> vector<2x32xf32>
      %c0_103 = arith.constant 0 : index
      %c0_104 = arith.constant 0 : index
      %256 = vector.load %arg17[%c0_103, %c0_104] : memref<1x32xf32, #tpu.memory_space<vmem>>, vector<1x32xf32>
      %257 = vector.broadcast %256 : vector<1x32xf32> to vector<2x32xf32>
      %258 = arith.addf %255, %257 : vector<2x32xf32>
      %259 = math.tanh %258 : vector<2x32xf32>
      %c0_105 = arith.constant 0 : index
      %c0_106 = arith.constant 0 : index
      %260 = vector.load %arg19[%c0_105, %c0_106] : memref<2x32xf32, #tpu.memory_space<vmem>>, vector<2x32xf32>
      tpu.vector_store %arg19[%c0_105, %c0_106], %259 {strides = array<i32>} : memref<2x32xf32, #tpu.memory_space<vmem>>, vector<2x32xf32>,
    } else {
    }
    return
  }
  func.func @transform_0(%arg0: i32) -> (i32, i32) {
    %c0_i32 = arith.constant 0 : i32
    %c0_i32_0 = arith.constant 0 : i32
    %c0_i32_1 = arith.constant 0 : i32
    return %c0_i32, %c0_i32_0 : i32, i32
  }
  func.func @transform_1(%arg0: i32) -> (i32, i32) {
    %c0_i32 = arith.constant 0 : i32
    %c0_i32_0 = arith.constant 0 : i32
    %c0_i32_1 = arith.constant 0 : i32
    return %c0_i32, %c0_i32_0 : i32, i32
  }
  func.func @transform_2(%arg0: i32) -> (i32, i32) {
    %c0_i32 = arith.constant 0 : i32
    %c0_i32_0 = arith.constant 0 : i32
    %c0_i32_1 = arith.constant 0 : i32
    return %c0_i32, %c0_i32_0 : i32, i32
  }
  func.func @transform_3(%arg0: i32) -> (i32, i32, i32) {
    %c0_i32 = arith.constant 0 : i32
    %c0_i32_0 = arith.constant 0 : i32
    %c0_i32_1 = arith.constant 0 : i32
    return %arg0, %c0_i32, %c0_i32_0 : i32, i32, i32
  }
  func.func @transform_4(%arg0: i32) -> (i32, i32, i32) {
    %c0_i32 = arith.constant 0 : i32
    %c0_i32_0 = arith.constant 0 : i32
    %c0_i32_1 = arith.constant 0 : i32
    return %arg0, %c0_i32, %c0_i32_0 : i32, i32, i32
  }
  func.func @transform_5(%arg0: i32) -> (i32, i32, i32) {
    %c0_i32 = arith.constant 0 : i32
    %c0_i32_0 = arith.constant 0 : i32
    %c0_i32_1 = arith.constant 0 : i32
    return %arg0, %c0_i32, %c0_i32_0 : i32, i32, i32
  }
  func.func @transform_6(%arg0: i32) -> (i32, i32, i32) {
    %c0_i32 = arith.constant 0 : i32
    %c0_i32_0 = arith.constant 0 : i32
    %c0_i32_1 = arith.constant 0 : i32
    return %arg0, %c0_i32, %c0_i32_0 : i32, i32, i32
  }
  func.func @transform_7(%arg0: i32) -> (i32, i32, i32) {
    %c0_i32 = arith.constant 0 : i32
    %c0_i32_0 = arith.constant 0 : i32
    %c0_i32_1 = arith.constant 0 : i32
    return %arg0, %c0_i32, %c0_i32_0 : i32, i32, i32
  }
  func.func @transform_8(%arg0: i32) -> (i32, i32, i32) {
    %c0_i32 = arith.constant 0 : i32
    %c0_i32_0 = arith.constant 0 : i32
    %c0_i32_1 = arith.constant 0 : i32
    return %arg0, %c0_i32, %c0_i32_0 : i32, i32, i32
  }
  func.func @transform_9(%arg0: i32) -> (i32, i32, i32) {
    %c0_i32 = arith.constant 0 : i32
    %c0_i32_0 = arith.constant 0 : i32
    %c0_i32_1 = arith.constant 0 : i32
    return %arg0, %c0_i32, %c0_i32_0 : i32, i32, i32
  }
  func.func @transform_10(%arg0: i32) -> (i32, i32, i32) {
    %c0_i32 = arith.constant 0 : i32
    %c0_i32_0 = arith.constant 0 : i32
    %c0_i32_1 = arith.constant 0 : i32
    return %arg0, %c0_i32, %c0_i32_0 : i32, i32, i32
  }
  func.func @transform_11(%arg0: i32) -> (i32, i32, i32) {
    %c0_i32 = arith.constant 0 : i32
    %c0_i32_0 = arith.constant 0 : i32
    %c0_i32_1 = arith.constant 0 : i32
    return %arg0, %c0_i32, %c0_i32_0 : i32, i32, i32
  }
  func.func @transform_12(%arg0: i32) -> (i32, i32, i32) {
    %c0_i32 = arith.constant 0 : i32
    %c0_i32_0 = arith.constant 0 : i32
    %c0_i32_1 = arith.constant 0 : i32
    return %arg0, %c0_i32, %c0_i32_0 : i32, i32, i32
  }
  func.func @transform_13(%arg0: i32) -> (i32, i32, i32) {
    %c0_i32 = arith.constant 0 : i32
    %c0_i32_0 = arith.constant 0 : i32
    %c0_i32_1 = arith.constant 0 : i32
    return %arg0, %c0_i32, %c0_i32_0 : i32, i32, i32
  }
  func.func @transform_14(%arg0: i32) -> (i32, i32, i32) {
    %c0_i32 = arith.constant 0 : i32
    %c0_i32_0 = arith.constant 0 : i32
    %c0_i32_1 = arith.constant 0 : i32
    return %arg0, %c0_i32, %c0_i32_0 : i32, i32, i32
  }
  func.func @transform_15(%arg0: i32) -> (i32, i32) {
    %c0_i32 = arith.constant 0 : i32
    %c0_i32_0 = arith.constant 0 : i32
    %c0_i32_1 = arith.constant 0 : i32
    return %c0_i32, %c0_i32_0 : i32, i32
  }
  func.func @transform_16(%arg0: i32) -> (i32, i32) {
    %c0_i32 = arith.constant 0 : i32
    %c0_i32_0 = arith.constant 0 : i32
    %c0_i32_1 = arith.constant 0 : i32
    return %c0_i32, %c0_i32_0 : i32, i32
  }
  func.func @transform_17(%arg0: i32) -> (i32, i32) {
    %c0_i32 = arith.constant 0 : i32
    %c0_i32_0 = arith.constant 0 : i32
    %c0_i32_1 = arith.constant 0 : i32
    return %c0_i32, %c0_i32_0 : i32, i32
  }
  func.func @transform_18(%arg0: i32) -> (i32, i32) {
    %c0_i32 = arith.constant 0 : i32
    %c0_i32_0 = arith.constant 0 : i32
    %c0_i32_1 = arith.constant 0 : i32
    return %c0_i32, %c0_i32_0 : i32, i32
  }
}

</mosaic_0001>

<bundles_post_ra>
// kernel: _lambda_.2
= control target key start
LH: loop header
LB: loop body
LE: loop exit
PB: predicated region body
PF: predicated region fallthrough
CT: control target
= control target key end

     0   :  { %16 = vsyncpa [#allocation3], 0  ;;  %s1263_s0 = inlined_call_operand.vmem [shape: f32[2,16], index: 0, kind: input, shape index: {}]   ;;  %s1264_s1 = inlined_call_operand.vmem [shape: f32[16,256], index: 1, kind: input, shape index: {}]   ;;  %s1265_s2 = inlined_call_operand.vmem [shape: f32[1,256], index: 2, kind: input, shape index: {}]   ;;  %s1266_s3 = inlined_call_operand.hbm [shape: f32[256,128], index: 3, kind: input, shape index: {}]   ;;  %s1267_s4 = inlined_call_operand.vmem [shape: f32[1,128], index: 4, kind: input, shape index: {}]   ;;  %s1268_s5 = inlined_call_operand.hbm [shape: f32[128,128], index: 5, kind: input, shape index: {}]   ;;  %s1269_s6 = inlined_call_operand.vmem [shape: f32[1,128], index: 6, kind: input, shape index: {}]   ;;  %s1270_s7 = inlined_call_operand.vmem [shape: f32[32,16], index: 7, kind: input, shape index: {}]   ;;  %s1271_s8 = inlined_call_operand.vmem [shape: f32[1,16], index: 8, kind: input, shape index: {}]   ;;  %s1272_s9 = inlined_call_operand.vmem [shape: s32[2,4], index: 9, kind: output, shape index: {0}]   ;;  %s1273_s10 = inlined_call_operand.hbm [shape: f32[1,1], index: 10, kind: output, shape index: {1}]  }
   0x1   :  { %17 = vsyncpa [#allocation6], 0 }
   0x2   :  { %18 = vsyncpa [#allocation4], 0  ;;  %s1078_s13 = smov [#allocation2]  }
   0x3   :  { %s30_s14 = sshll.u32 %s1078_s13, 4  ;;  %s31_s14 = int_to_ptr.vmem [resolvable:$true] %s30_s14 }
   0x4   :  { %s1020_s15 = scalar_lea.vmem %s31_s14, 4096  ;;  %p1025_p1 = scmp.lt.s32.totalorder %s31_s14, %s31_s14 }
   0x5   :  { %p1021_p0 = scmp.ne.s32.totalorder %s31_s14, %s1020_s15  ;;  %p1026_p2 = scmp.lt.s32.totalorder %s1020_s15, %s1020_s15 }
   0x7   :  { %p1027_p3 = por %p1026_p2, %p1025_p1 }
   0x9   :  { %p1028_p4 = pnand %p1027_p3, %p1021_p0 }
   0xb   :  { %1031 = shalt.err (!%p1028_p4)
}
   0xc   :  { %s1079_s16 = smov 128   ;;  %s1080_s17 = smov 8  }
   0xd   :  { %36 = dma.hbm_to_vmem [thread:$0]  %s1266_s3, 4096, %s31_s14, [#allocation3], %s1079_s16, %s1079_s16, %s1080_s17  }
   0xe   :  { %s1081_s20 = smov [#allocation5]  }
   0xf   :  { %s44_s21 = sshll.u32 %s1081_s20, 4  ;;  %s45_s21 = int_to_ptr.vmem [resolvable:$true] %s44_s21 }
  0x10   :  { %s1040_s22 = scalar_lea.vmem %s45_s21, 2048  ;;  %p1045_p6 = scmp.lt.s32.totalorder %s45_s21, %s45_s21 }
  0x11   :  { %p1041_p5 = scmp.ne.s32.totalorder %s45_s21, %s1040_s22  ;;  %p1046_p7 = scmp.lt.s32.totalorder %s1040_s22, %s1040_s22 }
  0x13   :  { %p1047_p8 = por %p1046_p7, %p1045_p6 }
  0x15   :  { %p1048_p9 = pnand %p1047_p8, %p1041_p5 }
  0x17   :  { %1051 = shalt.err (!%p1048_p9)
}
  0x18   :  { %50 = dma.hbm_to_vmem [thread:$0]  %s1268_s5, 2048, %s45_s21, [#allocation6], %s1079_s16, %s1079_s16, %s1080_s17  }
  0x19   :  { %1072 = dma.done.wait [#allocation3], 4096  }
  0x1a   :  { %1073 = vsyncadd [#allocation3], 4294963200 }
  0x1b   :  { %1074 = dma.done.wait [#allocation6], 2048  }
  0x1c   :  { %1075 = vsyncadd [#allocation6], 4294965248  ;;  %v1082_v0 = vmov 0.0   ;;  %v67_v1 = vld [vmem:[%s1264_s1 + $0x18] sm:$0xff]  ;;  %v66_v2 = vld [vmem:[%s1264_s1 + $0x10] sm:$0xff]  ;;  %vm80_vm0 = vcmask 130048   ;;  %v70_v49 = vlaneseq }
  0x1d   :  { %148 = vmatprep.mubr.f32.mxu0 %v1082_v0  ;;  %v65_v3 = vld [vmem:[%s1264_s1 + $0x8] sm:$0xff]  ;;  %112 = vmatprep.subr.mxu0 %v67_v1  ;;  %v64_v4 = vld [vmem:[%s1264_s1] sm:$0xff]  ;;  %v188_v6 = vld [vmem:[#allocation2 + $0xf8] sm:$0xff]  ;;  %vm1083_vm1 = vmmov 0   ;;  %vm369_vm2 = vcmask 261120   ;;  %s1084_s23 = smov 32  }
  0x1e   :  { %v63_v5 = vld [vmem:[%s1263_s0] sm:$0x3]  ;;  %113 = vmatpush1.msra.mxu0 %v66_v2  ;;  %849 = vmatprep.subr.mxu1 %v188_v6  ;;  %v172_v7 = vld [vmem:[#allocation2 + $0x78] sm:$0xff]  ;;  %v187_v8 = vld [vmem:[#allocation2 + $0xf0] sm:$0xff]  ;;  %v71_v50 = vshrl.u32 %v70_v49, 7  ;;  %s1085_s24 = smov 96  }
  0x1f   :  { %v171_v9 = vld [vmem:[#allocation2 + $0x70] sm:$0xff]  ;;  %114 = vmatprep.subr.mxu0 %v65_v3  ;;  %850 = vmatpush3.msra.mxu1 %v172_v7  ;;  %v186_v10 = vld [vmem:[#allocation2 + $0xe8] sm:$0xff]  ;;  %v185_v12 = vld [vmem:[#allocation2 + $0xe0] sm:$0xff]  ;;  %vm361_vm3 = vcmask 254976   ;;  %vm453_vm4 = vcmask 123904   ;;  %vm790_vm8 = vcmask 7168  }
  0x20   :  { %115 = vmatpush1.msra.mxu0 %v64_v4  ;;  %851 = vmatprep.subr.mxu1 %v187_v8  ;;  %v170_v11 = vld [vmem:[#allocation2 + $0x68] sm:$0xff]  ;;  %v169_v13 = vld [vmem:[#allocation2 + $0x60] sm:$0xff]  ;;  %v184_v14 = vld [vmem:[#allocation2 + $0xd8] sm:$0xff]  ;;  %v72_v51 = vsub.s32 0, %v71_v50  ;;  %v76_v53 = vsub.s32 1, %v71_v50  ;;  %vm792_vm9 = vcmask 15360  }
  0x21   :  { %841 = vmatmul.mubr.msk.f32.vlgmr.msra.gmra.mxu0 %vm80_vm0, %v63_v5  ;;  %852 = vmatpush3.msra.mxu1 %v171_v9  ;;  %v168_v15 = vld [vmem:[#allocation2 + $0x58] sm:$0xff]  ;;  %v183_v16 = vld [vmem:[#allocation2 + $0xd0] sm:$0xff]  ;;  %v182_v18 = vld [vmem:[#allocation2 + $0xc8] sm:$0xff]  ;;  %vm794_vm11 = vcmask 23552   ;;  %vm796_vm12 = vcmask 25600   ;;  %s1087_s27 = smov [#allocation7]  }
  0x22   :  { %853 = vmatprep.subr.mxu1 %v186_v10  ;;  %921 = vmatprep.subr.mxu0 %v1082_v0  ;;  %v167_v17 = vld [vmem:[#allocation2 + $0x50] sm:$0xff]  ;;  %v166_v19 = vld [vmem:[#allocation2 + $0x48] sm:$0xff]  ;;  %v181_v20 = vld [vmem:[#allocation2 + $0xc0] sm:$0xff]  ;;  %s829_s28 = sshll.u32 %s1087_s27, 4  ;;  %s830_s28 = int_to_ptr.vmem [resolvable:$true] %s829_s28 }
  0x23   :  { %854 = vmatpush3.msra.mxu1 %v170_v11  ;;  %v165_v21 = vld [vmem:[#allocation2 + $0x40] sm:$0xff]  ;;  %v180_v22 = vld [vmem:[#allocation2 + $0xb8] sm:$0xff]  ;;  %v179_v24 = vld [vmem:[#allocation2 + $0xb0] sm:$0xff]  ;;  %953 = vmatprep.mubr.msk.f32.mxu0 %vm1083_vm1, %v1082_v0  ;;  %s1052_s5 = scalar_lea.vmem %s830_s28, 16  ;;  %s1056_s30 = scalar_lea.vmem %s830_s28, 32 }
  0x24   :  { %855 = vmatprep.subr.mxu1 %v185_v12  ;;  %v164_v23 = vld [vmem:[#allocation2 + $0x38] sm:$0xff]  ;;  %v163_v25 = vld [vmem:[#allocation2 + $0x30] sm:$0xff]  ;;  %v178_v26 = vld [vmem:[#allocation2 + $0xa8] sm:$0xff]  ;;  %p1053_p10 = scmp.ne.s32.totalorder %s830_s28, %s1052_s5  ;;  %p1057_p11 = scmp.lt.s32.totalorder %s830_s28, %s830_s28 }
  0x25   :  { %856 = vmatpush3.msra.mxu1 %v169_v13  ;;  %v162_v27 = vld [vmem:[#allocation2 + $0x28] sm:$0xff]  ;;  %v177_v28 = vld [vmem:[#allocation2 + $0xa0] sm:$0xff]  ;;  %v176_v30 = vld [vmem:[#allocation2 + $0x98] sm:$0xff]  ;;  %p1058_p12 = scmp.lt.s32.totalorder %s1056_s30, %s1052_s5 }
  0x26   :  { %857 = vmatprep.subr.mxu1 %v184_v14  ;;  %v161_v29 = vld [vmem:[#allocation2 + $0x20] sm:$0xff]  ;;  %v160_v31 = vld [vmem:[#allocation2 + $0x18] sm:$0xff]  ;;  %v175_v32 = vld [vmem:[#allocation2 + $0x90] sm:$0xff] }
  0x27   :  { %858 = vmatpush3.msra.mxu1 %v168_v15  ;;  %v159_v33 = vld [vmem:[#allocation2 + $0x10] sm:$0xff]  ;;  %v174_v34 = vld [vmem:[#allocation2 + $0x88] sm:$0xff]  ;;  %v173_v36 = vld [vmem:[#allocation2 + $0x80] sm:$0xff]  ;;  %p1059_p13 = por %p1058_p12, %p1057_p11 }
  0x28   :  { %859 = vmatprep.subr.mxu1 %v183_v16  ;;  %v158_v35 = vld [vmem:[#allocation2 + $0x8] sm:$0xff]  ;;  %v157_v37 = vld [vmem:[#allocation2] sm:$0xff]  ;;  %v282_v38 = vld [vmem:[#allocation5 + $0x78] sm:$0xff] }
  0x29   :  { %860 = vmatpush3.msra.mxu1 %v167_v17  ;;  %v281_v39 = vld [vmem:[#allocation5 + $0x70] sm:$0xff]  ;;  %922 = vmatpush3.msra.mxu0 %v282_v38  ;;  %v280_v40 = vld [vmem:[#allocation5 + $0x68] sm:$0xff]  ;;  %v279_v41 = vld [vmem:[#allocation5 + $0x60] sm:$0xff]  ;;  %p1060_p0 = pnand %p1059_p13, %p1053_p10 }
  0x2a   :  { %861 = vmatprep.subr.mxu1 %v182_v18  ;;  %923 = vmatprep.subr.mxu0 %v1082_v0  ;;  %v278_v42 = vld [vmem:[#allocation5 + $0x58] sm:$0xff]  ;;  %v277_v43 = vld [vmem:[#allocation5 + $0x50] sm:$0xff]  ;;  %v276_v44 = vld [vmem:[#allocation5 + $0x48] sm:$0xff] }
  0x2b   :  { %862 = vmatpush3.msra.mxu1 %v166_v19  ;;  %924 = vmatpush3.msra.mxu0 %v281_v39  ;;  %v275_v45 = vld [vmem:[#allocation5 + $0x40] sm:$0xff]  ;;  %v274_v46 = vld [vmem:[#allocation5 + $0x38] sm:$0xff]  ;;  %v273_v47 = vld [vmem:[#allocation5 + $0x30] sm:$0xff] }
  0x2c   :  { %863 = vmatprep.subr.mxu1 %v181_v20  ;;  %925 = vmatprep.subr.mxu0 %v1082_v0  ;;  %v272_v48 = vld [vmem:[#allocation5 + $0x28] sm:$0xff]  ;;  %v68_v52 = vld [vmem:[%s1265_s2] sm:$0x3]  ;;  %v270_v63 = vld [vmem:[#allocation5 + $0x18] sm:$0xff] }
  0x2d   :  { %864 = vmatpush3.msra.mxu1 %v165_v21  ;;  %926 = vmatpush3.msra.mxu0 %v280_v40  ;;  %v73_v54 = vrot.slane %v68_v52, %v72_v51  ;;  %v77_v55 = vrot.slane %v68_v52, %v76_v53  ;;  %v271_v62 = vld [vmem:[#allocation5 + $0x20] sm:$0xff]  ;;  %v269_v1 = vld [vmem:[#allocation5 + $0x10] sm:$0xff]  ;;  %v268_v2 = vld [vmem:[#allocation5 + $0x8] sm:$0xff] }
  0x2e   :  { %865 = vmatprep.subr.mxu1 %v180_v22  ;;  %927 = vmatprep.subr.mxu0 %v1082_v0  ;;  %v267_v3 = vld [vmem:[#allocation5] sm:$0xff]  ;;  %v368_v4 = vld [vmem:[%s1270_s7 + $0x18] sm:$0xff]  ;;  %v367_v5 = vld [vmem:[%s1270_s7 + $0x10] sm:$0xff] }
  0x2f   :  { %866 = vmatpush3.msra.mxu1 %v164_v23  ;;  %928 = vmatpush3.msra.mxu0 %v279_v41  ;;  %v842_v7 = vld [vmem:[%s1267_s4] ss:$0 sm:$0xff]  ;;  %v366_v12 = vld [vmem:[%s1270_s7 + $0x8] sm:$0xff] }
  0x30   :  { %867 = vmatprep.subr.mxu1 %v179_v24  ;;  %929 = vmatprep.subr.mxu0 %v1082_v0  ;;  %v365_v13 = vld [vmem:[%s1270_s7] sm:$0xff]  ;;  %s1086_s7 = smov 64  }
  0x31   :  { %868 = vmatpush3.msra.mxu1 %v163_v25  ;;  %930 = vmatpush3.msra.mxu0 %v278_v42  ;;  %v843_v14 = vld [vmem:[%s1269_s6] ss:$0 sm:$0xff] }
  0x32   :  { %869 = vmatprep.subr.mxu1 %v178_v26  ;;  %931 = vmatprep.subr.mxu0 %v1082_v0 }
  0x33   :  { %870 = vmatpush3.msra.mxu1 %v162_v27  ;;  %932 = vmatpush3.msra.mxu0 %v277_v43 }
  0x34   :  { %871 = vmatprep.subr.mxu1 %v177_v28  ;;  %933 = vmatprep.subr.mxu0 %v1082_v0 }
  0x35   :  { %872 = vmatpush3.msra.mxu1 %v161_v29  ;;  %934 = vmatpush3.msra.mxu0 %v276_v44 }
  0x36   :  { %873 = vmatprep.subr.mxu1 %v176_v30  ;;  %935 = vmatprep.subr.mxu0 %v1082_v0 }
  0x37   :  { %874 = vmatpush3.msra.mxu1 %v160_v31  ;;  %936 = vmatpush3.msra.mxu0 %v275_v45 }
  0x38   :  { %875 = vmatprep.subr.mxu1 %v175_v32  ;;  %937 = vmatprep.subr.mxu0 %v1082_v0 }
  0x39   :  { %876 = vmatpush3.msra.mxu1 %v159_v33  ;;  %938 = vmatpush3.msra.mxu0 %v274_v46  ;;  %v845_v33 = vld [vmem:[%s1271_s8] ss:$0 sm:$0xff] }
  0x3a   :  { %877 = vmatprep.subr.mxu1 %v174_v34  ;;  %939 = vmatprep.subr.mxu0 %v1082_v0 }
  0x3b   :  { %878 = vmatpush3.msra.mxu1 %v158_v35  ;;  %940 = vmatpush3.msra.mxu0 %v273_v47 }
  0x3c   :  { %879 = vmatprep.subr.mxu1 %v173_v36  ;;  %941 = vmatprep.subr.mxu0 %v1082_v0 }
  0x3d   :  { %880 = vmatpush3.msra.mxu1 %v157_v37  ;;  %942 = vmatpush3.msra.mxu0 %v272_v48 }
  0x3e   :  { %956 = vmatprep.subr.mxu1 %v1082_v0  ;;  %943 = vmatprep.subr.mxu0 %v1082_v0 }
  0x3f   :  { %944 = vmatpush3.msra.mxu0 %v271_v62 }
  0x40   :  { %945 = vmatprep.subr.mxu0 %v1082_v0 }
  0x41   :  { %946 = vmatpush3.msra.mxu0 %v270_v63 }
  0x42   :  { %947 = vmatprep.subr.mxu0 %v1082_v0 }
  0x43   :  { %948 = vmatpush3.msra.mxu0 %v269_v1 }
  0x44   :  { %949 = vmatprep.subr.mxu0 %v1082_v0 }
  0x45   :  { %950 = vmatpush3.msra.mxu0 %v268_v2 }
  0x46   :  { %951 = vmatprep.subr.mxu0 %v1082_v0 }
  0x47   :  { %952 = vmatpush3.msra.mxu0 %v267_v3 }
  0x48   :  { %967 = vmatprep.subr.mxu0 %v1082_v0 }
  0xe1   :  { %v150_v56 = vpop.f32.mrf.mxu0 }
  0xe2   :  { %v151_v57 = vadd.f32 %v150_v56, %v73_v54 }
  0xe3   :  { %v152_v58 = vpop.f32.mrf.mxu0 }
  0xe4   :  { %v153_v59 = vadd.f32 %v152_v58, %v77_v55  ;;  %v155_v61 = vmax.f32 %v151_v57, 0.0  ;;  %v458_v58 = vand.u32 127, %v70_v49 }
  0xe6   :  { %v156_v60 = vmax.f32 %v153_v59, 0.0 }
  0xe8   :  { %260 = vmatprep.mubr.f32.mxu1 %v156_v60 }
  0xe9   :  { %261 = vmatmul.mubr.f32.vlgmr.msra.gmra.mxu1 %v155_v61 }
  0xea   :  { %964 = vmatprep.mubr.msk.f32.mxu1 %vm1083_vm1, %v1082_v0  ;;  %957 = vmatpush3.msra.mxu1 %v368_v4 }
  0xeb   :  { %958 = vmatprep.subr.mxu1 %v1082_v0 }
  0xec   :  { %959 = vmatpush3.msra.mxu1 %v367_v5 }
  0xed   :  { %960 = vmatprep.subr.mxu1 %v1082_v0 }
  0xee   :  { %961 = vmatpush3.msra.mxu1 %v366_v12 }
  0xef   :  { %962 = vmatprep.subr.mxu1 %v1082_v0 }
  0xf0   :  { %963 = vmatpush3.msra.mxu1 %v365_v13 }
  0xf1   :  { %978 = vmatprep.subr.mxu1 %v1082_v0 }
 0x1a9   :  { %v881_v6 = vpop.f32.mrf.mxu1 }
 0x1ab   :  { %v882_v8 = vpop.f32.mrf.mxu1 }
 0x1ac   :  { %v883_v9 = vadd.f32 %v882_v8, %v881_v6 }
 0x1ae   :  { %v263_v10 = vadd.f32 %v883_v9, %v842_v7 }
 0x1b0   :  { %v266_v11 = vmax.f32 %v263_v10, 0.0 }
 0x1b2   :  { %954 = vmatmul.mubr.f32.vlgmr.msra.gmra.mxu0 %v266_v11 }
 0x1b3   :  { %968 = vmatpush3.msra.mxu0 %v368_v4  ;;  %975 = vmatprep.mubr.msk.f32.mxu0 %vm1083_vm1, %v1082_v0 }
 0x1b4   :  { %969 = vmatprep.subr.mxu0 %v1082_v0 }
 0x1b5   :  { %970 = vmatpush3.msra.mxu0 %v367_v5 }
 0x1b6   :  { %971 = vmatprep.subr.mxu0 %v1082_v0 }
 0x1b7   :  { %972 = vmatpush3.msra.mxu0 %v366_v12 }
 0x1b8   :  { %973 = vmatprep.subr.mxu0 %v1082_v0 }
 0x1b9   :  { %974 = vmatpush3.msra.mxu0 %v365_v13 }
 0x1ba   :  { %989 = vmatprep.subr.mxu0 %v1082_v0 }
 0x272   :  { %v356_v15 = vpop.f32.mrf.mxu0 }
 0x273   :  { %v357_v16 = vadd.f32 %v843_v14, %v356_v15 }
 0x274   :  { %v955_v17 = vpop.f32.mrf.mxu0 }
 0x275   :  { %692 = vrot.lane.b32.xlu1 %v357_v16, %s1084_s23  ;;  %484 = vrot.lane.b32.xlu0 %v357_v16, %s1085_s24  ;;  %v360_v18 = vmul.f32 %v357_v16, %v357_v16 }
 0x276   :  { %965 = vmatmul.mubr.msk.f32.vlgmr.msra.gmra.mxu1 %vm369_vm2, %v357_v16 }
 0x277   :  { %979 = vmatpush3.msra.mxu1 %v368_v4  ;;  %986 = vmatprep.mubr.msk.f32.mxu1 %vm1083_vm1, %v1082_v0  ;;  %v362_v19 = vsel %vm361_vm3, %v360_v18, 0.0 }
 0x278   :  { %980 = vmatprep.subr.mxu1 %v1082_v0 }
 0x279   :  { %588 = vrot.lane.b32.xlu0 %v357_v16, %s1086_s7  ;;  %478 = vrot.lane.b32.xlu1 %v360_v18, %s1085_s24 }
 0x27a   :  { %981 = vmatpush3.msra.mxu1 %v367_v5 }
 0x27b   :  { %982 = vmatprep.subr.mxu1 %v1082_v0 }
 0x27c   :  { %983 = vmatpush3.msra.mxu1 %v366_v12 }
 0x27d   :  { %582 = vrot.lane.b32.xlu0 %v360_v18, %s1086_s7  ;;  %686 = vrot.lane.b32.xlu1 %v360_v18, %s1084_s23 }
 0x27e   :  { %984 = vmatprep.subr.mxu1 %v1082_v0 }
 0x27f   :  { %985 = vmatpush3.msra.mxu1 %v365_v13 }
 0x29c   :  { %363 = vadd.xlane.f32.xlu0 %v362_v19 }
 0x2e7   :  { %v693_v20 = vpop.permute.xlu1 %692  ;;  %v485_v21 = vpop.permute.xlu0 %484 }
 0x2e8   :  { %976 = vmatmul.mubr.msk.f32.vlgmr.msra.gmra.mxu0 %vm369_vm2, %v485_v21 }
 0x2e9   :  { %990 = vmatpush3.msra.mxu0 %v368_v4  ;;  %997 = vmatprep.mubr.msk.f32.mxu0 %vm1083_vm1, %v1082_v0  ;;  %vm819_vm1 = vcmask 0  }
 0x2ea   :  { %991 = vmatprep.subr.mxu0 %v1082_v0 }
 0x2eb   :  { %992 = vmatpush3.msra.mxu0 %v367_v5  ;;  %v589_v22 = vpop.permute.xlu0 %588  ;;  %v479_v23 = vpop.permute.xlu1 %478 }
 0x2ec   :  { %993 = vmatprep.subr.mxu0 %v1082_v0  ;;  %987 = vmatmul.mubr.msk.f32.vlgmr.msra.gmra.mxu1 %vm369_vm2, %v589_v22  ;;  %v481_v24 = vsel %vm361_vm3, %v479_v23, 0.0 }
 0x2ed   :  { %994 = vmatpush3.msra.mxu0 %v366_v12  ;;  %482 = vadd.xlane.f32.xlu1 %v481_v24 }
 0x2ee   :  { %995 = vmatprep.subr.mxu0 %v1082_v0 }
 0x2ef   :  { %996 = vmatpush3.msra.mxu0 %v365_v13  ;;  %v583_v25 = vpop.permute.xlu0 %582  ;;  %v687_v27 = vpop.permute.xlu1 %686 }
 0x2f0   :  { %998 = vmatmul.mubr.msk.f32.vlgmr.msra.gmra.mxu0 %vm369_vm2, %v693_v20  ;;  %v585_v26 = vsel %vm361_vm3, %v583_v25, 0.0  ;;  %v689_v28 = vsel %vm361_vm3, %v687_v27, 0.0 }
 0x2f1   :  { %586 = vadd.xlane.f32.xlu0 %v585_v26 }
 0x2f5   :  { %690 = vadd.xlane.f32.xlu0 %v689_v28 }
 0x325   :  { %v364_v31 = vpop.xlane.xlu0 %363 }
 0x336   :  { %v439_v29 = vpop.f32.mrf.mxu1 }
 0x337   :  { %v443_v30 = vmul.f32 2.0, %v439_v29 }
 0x338   :  { %v966_v32 = vpop.f32.mrf.mxu1 }
 0x339   :  { %v444_v0 = vsub.f32 %v364_v31, %v443_v30 }
 0x33b   :  { %v452_v34 = vadd.f32 %v845_v33, %v444_v0 }
 0x33d   :  { %v454_v35 = vsel %vm453_vm4, %v452_v34, inf }
 0x33e   :  { %455 = vmin.xlane.f32.xlu1 %v454_v35 }
 0x376   :  { %v483_v38 = vpop.xlane.xlu1 %482 }
 0x37a   :  { %v587_v41 = vpop.xlane.xlu0 %586 }
 0x37e   :  { %v691_v52 = vpop.xlane.xlu0 %690 }
 0x3a8   :  { %v554_v36 = vpop.f32.mrf.mxu0 }
 0x3a9   :  { %v558_v37 = vmul.f32 2.0, %v554_v36 }
 0x3aa   :  { %v977_v39 = vpop.f32.mrf.mxu0 }
 0x3ab   :  { %v559_v40 = vsub.f32 %v483_v38, %v558_v37 }
 0x3ac   :  { %v658_v42 = vpop.f32.mrf.mxu1 }
 0x3ad   :  { %v662_v43 = vmul.f32 2.0, %v658_v42  ;;  %v560_v44 = vadd.f32 %v845_v33, %v559_v40 }
 0x3ae   :  { %v988_v45 = vpop.f32.mrf.mxu1 }
 0x3af   :  { %v663_v46 = vsub.f32 %v587_v41, %v662_v43  ;;  %v561_v47 = vsel %vm453_vm4, %v560_v44, inf }
 0x3b0   :  { %v762_v48 = vpop.f32.mrf.mxu0  ;;  %562 = vmin.xlane.f32.xlu0 %v561_v47 }
 0x3b1   :  { %v766_v50 = vmul.f32 2.0, %v762_v48  ;;  %v664_v51 = vadd.f32 %v845_v33, %v663_v46 }
 0x3b2   :  { %v999_v53 = vpop.f32.mrf.mxu0 }
 0x3b3   :  { %v767_v54 = vsub.f32 %v691_v52, %v766_v50  ;;  %v665_v55 = vsel %vm453_vm4, %v664_v51, inf }
 0x3b4   :  { %666 = vmin.xlane.f32.xlu1 %v665_v55 }
 0x3b5   :  { %v768_v56 = vadd.f32 %v845_v33, %v767_v54 }
 0x3b7   :  { %v769_v57 = vsel %vm453_vm4, %v768_v56, inf }
 0x3b8   :  { %770 = vmin.xlane.f32.xlu0 %v769_v57 }
 0x3c7   :  { %v456_v59 = vpop.xlane.xlu1 %455 }
 0x3c8   :  { %vm459_vm5 = vcmp.le.f32.partialorder %v452_v34, %v456_v59  ;;  %v476_v10 = vmax.f32 %v456_v59, 0.0 }
 0x3c9   :  { %v460_v60 = vsel %vm459_vm5, %v458_v58, 16 }
 0x3ca   :  { %v461_v61 = vsel %vm453_vm4, %v460_v60, 2147483647 }
 0x3cb   :  { %v463_v62 = vshra.s32 %v461_v61, 16  ;;  %v462_v23 = vand.u32 65535, %v461_v61 }
 0x3cd   :  { %v465_v63 = vcvt.s32.f32 %v463_v62  ;;  %v464_v25 = vcvt.s32.f32 %v462_v23 }
 0x3cf   :  { %466 = vmin.xlane.f32.xlu1 %v465_v63 }
 0x439   :  { %v563_v1 = vpop.xlane.xlu0 %562 }
 0x43a   :  { %vm564_vm6 = vcmp.le.f32.partialorder %v560_v44, %v563_v1  ;;  %v581_v6 = vmax.f32 %v563_v1, 0.0 }
 0x43b   :  { %v565_v2 = vsel %vm564_vm6, %v458_v58, 16 }
 0x43c   :  { %v566_v3 = vsel %vm453_vm4, %v565_v2, 2147483647  ;;  %v798_v16 = vsel %vm790_vm8, %v476_v10, %v581_v6 }
 0x43d   :  { %v667_v4 = vpop.xlane.xlu1 %666  ;;  %v568_v5 = vshra.s32 %v566_v3, 16  ;;  %v567_v27 = vand.u32 65535, %v566_v3 }
 0x43e   :  { %vm668_vm7 = vcmp.le.f32.partialorder %v664_v51, %v667_v4  ;;  %v685_v49 = vmax.f32 %v667_v4, 0.0 }
 0x43f   :  { %v669_v7 = vsel %vm668_vm7, %v458_v58, 16  ;;  %v570_v8 = vcvt.s32.f32 %v568_v5  ;;  %v569_v29 = vcvt.s32.f32 %v567_v27 }
 0x440   :  { %v670_v9 = vsel %vm453_vm4, %v669_v7, 2147483647  ;;  %v799_v18 = vsel %vm792_vm9, %v798_v16, %v685_v49 }
 0x441   :  { %v771_v11 = vpop.xlane.xlu0 %770  ;;  %571 = vmin.xlane.f32.xlu0 %v570_v8  ;;  %v672_v12 = vshra.s32 %v670_v9, 16  ;;  %v671_v30 = vand.u32 65535, %v670_v9 }
 0x442   :  { %vm772_vm10 = vcmp.le.f32.partialorder %v768_v56, %v771_v11  ;;  %v789_v13 = vmax.f32 %v771_v11, 0.0 }
 0x443   :  { %v773_v14 = vsel %vm772_vm10, %v458_v58, 16  ;;  %v674_v15 = vcvt.s32.f32 %v672_v12  ;;  %v673_v33 = vcvt.s32.f32 %v671_v30 }
 0x444   :  { %v774_v17 = vsel %vm453_vm4, %v773_v14, 2147483647  ;;  %v800_v20 = vsel %vm794_vm11, %v799_v18, %v789_v13 }
 0x445   :  { %675 = vmin.xlane.f32.xlu1 %v674_v15  ;;  %v776_v19 = vshra.s32 %v774_v17, 16  ;;  %v801_v22 = vsel %vm796_vm12, %v800_v20, 0.0  ;;  %v775_v0 = vand.u32 65535, %v774_v17 }
 0x447   :  { %v778_v21 = vcvt.s32.f32 %v776_v19  ;;  %v777_v37 = vcvt.s32.f32 %v775_v0 }
 0x449   :  { %779 = vmin.xlane.f32.xlu0 %v778_v21  ;;  %802 = vadd.xlane.f32.xlu1 %v801_v22 }
 0x458   :  { %v467_v24 = vpop.xlane.xlu1 %466 }
 0x459   :  { %vm468_vm13 = vcmp.eq.f32.partialorder %v465_v63, %v467_v24 }
 0x45a   :  { %v469_v26 = vsel %vm468_vm13, %v464_v25, inf }
 0x45b   :  { %470 = vmin.xlane.f32.xlu0 %v469_v26 }
 0x4ca   :  { %v572_v28 = vpop.xlane.xlu0 %571 }
 0x4cb   :  { %vm573_vm14 = vcmp.eq.f32.partialorder %v570_v8, %v572_v28 }
 0x4cc   :  { %v574_v31 = vsel %vm573_vm14, %v569_v29, inf }
 0x4cd   :  { %575 = vmin.xlane.f32.xlu1 %v574_v31 }
 0x4ce   :  { %v676_v32 = vpop.xlane.xlu1 %675 }
 0x4cf   :  { %vm677_vm15 = vcmp.eq.f32.partialorder %v674_v15, %v676_v32 }
 0x4d0   :  { %v678_v34 = vsel %vm677_vm15, %v673_v33, inf }
 0x4d1   :  { %679 = vmin.xlane.f32.xlu0 %v678_v34 }
 0x4d2   :  { %v780_v35 = vpop.xlane.xlu0 %779  ;;  %v803_v36 = vpop.xlane.xlu1 %802 }
 0x4d3   :  { %v804_v38 = vrot.slane %v803_v36, 4  ;;  %vm781_vm0 = vcmp.eq.f32.partialorder %v778_v21, %v780_v35 }
 0x4d4   :  { %v782_v39 = vsel %vm781_vm0, %v777_v37, inf }
 0x4d5   :  { %v805_v40 = vadd.f32 %v804_v38, %v803_v36  ;;  %783 = vmin.xlane.f32.xlu1 %v782_v39 }
 0x4d7   :  { %v806_v41 = vrot.slane %v805_v40, 2 }
 0x4d9   :  { %v807_v42 = vadd.f32 %v806_v41, %v805_v40 }
 0x4db   :  { %v808_v43 = vrot.slane %v807_v42, 1 }
 0x4dd   :  { %v809_v44 = vadd.f32 %v808_v43, %v807_v42 }
 0x4df   :  { %1000 = vpush %v809_v44 }
 0x510   :  { %s1001_s8 = spop %1000 }
 0x511   :  { %s813_s25 = smul.f32 0.125, %s1001_s8 }
 0x513   :  { %s816_s26 = smul.f32 0.03125, %s813_s25 }
 0x515   :  { %s817_s29 = smul.f32 1.25, %s816_s26 }
 0x517   :  { %v818_v45 = vstv %s817_s29 }
 0x518   :  { %820 = vst.msk [vmem:[#allocation7] sm:$0x1] %vm819_vm1, %v818_v45 }
 0x519   :  { %1063 = shalt.err (!%p1060_p0)
}
 0x51a   :  { %832 = dma.vmem_to_hbm [thread:$0]  %s830_s28, 16, %s1273_s10, [#allocation4]   ;;  %v578_v46 = vcvt.f32.s32 %v572_v28  ;;  %v471_v47 = vpop.xlane.xlu0 %470  ;;  %v473_v48 = vcvt.f32.s32 %v467_v24  ;;  %v682_v51 = vcvt.f32.s32 %v676_v32  ;;  %v786_v59 = vcvt.f32.s32 %v780_v35 }
 0x51b   :  { %v472_v54 = vcvt.f32.s32 %v471_v47 }
 0x51c   :  { %v579_v53 = vshll.u32 %v578_v46, 16  ;;  %v474_v55 = vshll.u32 %v473_v48, 16  ;;  %v683_v58 = vshll.u32 %v682_v51, 16  ;;  %v787_v2 = vshll.u32 %v786_v59, 16 }
 0x51e   :  { %v475_v61 = vadd.s32 %v474_v55, %v472_v54 }
 0x556   :  { %v576_v50 = vpop.xlane.xlu1 %575 }
 0x557   :  { %v577_v52 = vcvt.f32.s32 %v576_v50 }
 0x559   :  { %v580_v56 = vadd.s32 %v579_v53, %v577_v52 }
 0x55a   :  { %v680_v57 = vpop.xlane.xlu0 %679 }
 0x55b   :  { %v681_v60 = vcvt.f32.s32 %v680_v57  ;;  %v791_v63 = vsel %vm790_vm8, %v475_v61, %v580_v56 }
 0x55d   :  { %v684_v62 = vadd.s32 %v683_v58, %v681_v60 }
 0x55e   :  { %v784_v1 = vpop.xlane.xlu1 %783 }
 0x55f   :  { %v793_v3 = vsel %vm792_vm9, %v791_v63, %v684_v62  ;;  %v785_v4 = vcvt.f32.s32 %v784_v1 }
 0x561   :  { %v788_v5 = vadd.s32 %v787_v2, %v785_v4 }
 0x563   :  { %v795_v6 = vsel %vm794_vm11, %v793_v3, %v788_v5 }
 0x564   :  { %797 = vst.msk [vmem:[%s1272_s9] sm:$0x3] %vm796_vm12, %v795_v6 }
 0x565   :  { %1076 = dma.done.wait [#allocation4], 16  }
 0x566   :  { %1077 = vsyncadd [#allocation4], 4294967280 }
 0x567   :  { %838 = vsyncpa [#allocation3], 1 }
 0x568   :  { %839 = vsyncpa [#allocation6], 1 }
 0x569   :  { %840 = vsyncpa [#allocation4], 1 }

// kernel: _lambda_.3
= control target key start
LH: loop header
LB: loop body
LE: loop exit
PB: predicated region body
PF: predicated region fallthrough
CT: control target
= control target key end

     0   :  { %s3832_s0 = inlined_call_operand.vmem [shape: f32[12,32], index: 0, kind: input, shape index: {}]   ;;  %s3833_s1 = inlined_call_operand.vmem [shape: f32[1,32], index: 1, kind: input, shape index: {}]   ;;  %s3834_s2 = inlined_call_operand.vmem [shape: f32[1,32], index: 2, kind: input, shape index: {}]   ;;  %s3835_s3 = inlined_call_operand.vmem [shape: f32[2,32,96], index: 3, kind: input, shape index: {}]   ;;  %s3836_s4 = inlined_call_operand.vmem [shape: f32[2,1,96], index: 4, kind: input, shape index: {}]   ;;  %s3837_s5 = inlined_call_operand.vmem [shape: f32[2,32,32], index: 5, kind: input, shape index: {}]   ;;  %s3838_s6 = inlined_call_operand.vmem [shape: f32[2,1,32], index: 6, kind: input, shape index: {}]   ;;  %s3839_s7 = inlined_call_operand.vmem [shape: f32[2,1,32], index: 7, kind: input, shape index: {}]   ;;  %s3840_s8 = inlined_call_operand.vmem [shape: f32[2,1,32], index: 8, kind: input, shape index: {}]   ;;  %s3841_s9 = inlined_call_operand.vmem [shape: f32[2,32,128], index: 9, kind: input, shape index: {}]   ;;  %s3842_s10 = inlined_call_operand.vmem [shape: f32[2,1,128], index: 10, kind: input, shape index: {}]   ;;  %s3843_s11 = inlined_call_operand.vmem [shape: f32[2,128,32], index: 11, kind: input, shape index: {}]   ;;  %s3844_s12 = inlined_call_operand.vmem [shape: f32[2,1,32], index: 12, kind: input, shape index: {}]   ;;  %s3845_s13 = inlined_call_operand.vmem [shape: f32[2,1,32], index: 13, kind: input, shape index: {}]   ;;  %s3846_s14 = inlined_call_operand.vmem [shape: f32[2,1,32], index: 14, kind: input, shape index: {}]   ;;  %s3847_s15 = inlined_call_operand.vmem [shape: f32[32,32], index: 15, kind: input, shape index: {}]   ;;  %s3848_s16 = inlined_call_operand.vmem [shape: f32[1,32], index: 16, kind: input, shape index: {}]   ;;  %s3849_s17 = inlined_call_operand.vmem [shape: f32[12,32], index: 17, kind: output, shape index: {0}]   ;;  %s3850_s18 = inlined_call_operand.hbm [shape: f32[2,32], index: 18, kind: output, shape index: {1}]  }
   0x1   :  { %3855 = sst [smem:[#allocation7_spill]] %s3832_s0 }
   0x2   :  { %3856 = sst [smem:[#allocation8_spill]] %s3833_s1 }
   0x3   :  { %3857 = sst [smem:[#allocation9_spill]] %s3834_s2 }
   0x4   :  { %3858 = sst [smem:[#allocation10_spill]] %s3835_s3 }
   0x5   :  { %3859 = sst [smem:[#allocation11_spill]] %s3837_s5 }
   0x6   :  { %3860 = sst [smem:[#allocation12_spill]] %s3847_s15 }
   0x7   :  { %3861 = sst [smem:[#allocation13_spill]] %s3848_s16 }
   0x8   :  { %3862 = sst [smem:[#allocation14_spill]] %s3849_s17 }
   0x9   :  { %3863 = sst [smem:[#allocation15_spill]] %s3850_s18 }
   0xa   :  { %24 = vsyncpa [#allocation4], 0  ;;  %s3450_s27 = smov 0  }
   0xb LB: > { %3864 = sst [smem:[#allocation6_spill]] %s3334_s27  ;;  %s3456_s28 = sadd.s32 4294967295, %s3334_s27   ;;  %s3334_s27 = sphi %s3450_s27, %s30_s27  }
   0xc   : > { %p2916_p0 = scmp.ge.s32.totalorder %s3334_s27, 1  ;;  %p600_p1 = scmp.lt.s32.totalorder %s3334_s27, 3 }
   0xe   : > { %p601_p2 = pnand %p2916_p0, %p600_p1 }
   0xf   : > { %p688_p3 = scmp.lt.s32.totalorder (!%p601_p2), %s3456_s28, 1  ;;  %s3865_s3 = sld [smem:[#allocation10_spill]] (!%p601_p2) }
  0x10   : > { %604 = sbr.rel (%p601_p2) target bundleno = 3053 (0xbed), region = 88  ;;  %s3866_s5 = sld [smem:[#allocation11_spill]] (!%p601_p2) }
  0x11   : > { %p2925_p4 = scmp.ne.s32.totalorder (!%p601_p2), %s3456_s28, 0 }
  0x15   : > { %s3462_s29 = scalar_select %p688_p3, %s3456_s28, 1 }
  0x16   : > { %s3867_s25 = sld [smem:[#allocation7_spill]] (!%p2925_p4) }
  0x17   : > { %s2981_s30 = sshll.u32 %s3462_s29, 5  ;;  %s2984_s17 = sshll.u32 %s3462_s29, 7 }
  0x18   : > { %s3472_s22 = scalar_lea.vmem %s3865_s3, %s2981_s30  ;;  %s3477_s24 = scalar_lea.vmem %s3866_s5, %s2981_s30 }
  0x19   : > { %s3494_s3 = scalar_lea.vmem %s3841_s9, %s2981_s30  ;;  %s717_s5 = scalar_lea.vmem %s3842_s10, %s3462_s29 }
  0x1a   : > { %s3504_s27 = scalar_lea.vmem %s3843_s11, %s2984_s17  ;;  %s725_s0 = scalar_lea.vmem %s3844_s12, %s3462_s29 }
  0x1b   : > { %s728_s20 = scalar_lea.vmem %s3845_s13, %s3462_s29  ;;  %s731_s15 = scalar_lea.vmem %s3846_s14, %s3462_s29 }
  0x1c   : > { %735 = sbr.rel (%p2925_p4) target bundleno = 347 (0x15b), region = 92  ;;  %s3868_s18 = sld [smem:[#allocation8_spill]] (!%p2925_p4) }
  0x1d   : > { %s3869_s21 = sld [smem:[#allocation9_spill]] (!%p2925_p4) }
  0x21   : > { %v736_v0 = vld [vmem:[%s3867_s25] sm:$0xff]  ;;  %vm740_vm0 = vcmask 261120   ;;  %v737_v1 = vld [vmem:[%s3867_s25 + $0x8] sm:$0xf]  ;;  %vm744_vm1 = vcmask 257024  }
  0x22   : > { %v741_v2 = vsel %vm740_vm0, %v736_v0, 0.0  ;;  %v745_v3 = vsel %vm744_vm1, %v737_v1, 0.0  ;;  %v2926_v21 = vld [vmem:[%s3868_s18] ss:$0 sm:$0xff] }
  0x23   : > { %742 = vadd.xlane.f32.xlu0 %v741_v2  ;;  %v2927_v23 = vld [vmem:[%s3869_s21] ss:$0 sm:$0xff] }
  0x27   : > { %746 = vadd.xlane.f32.xlu0 %v745_v3 }
  0xac   : > { %v743_v4 = vpop.xlane.xlu0 %742 }
  0xad   : > { %v749_v5 = vmul.f32 0.03125, %v743_v4 }
  0xaf   : > { %v751_v6 = vsub.f32 %v736_v0, %v749_v5 }
  0xb0   : > { %v747_v7 = vpop.xlane.xlu0 %746 }
  0xb1   : > { %v750_v8 = vmul.f32 0.03125, %v747_v7  ;;  %v753_v9 = vmul.f32 %v751_v6, %v751_v6 }
  0xb3   : > { %v752_v10 = vsub.f32 %v737_v1, %v750_v8  ;;  %v755_v11 = vsel %vm740_vm0, %v753_v9, 0.0 }
  0xb4   : > { %756 = vadd.xlane.f32.xlu1 %v755_v11 }
  0xb5   : > { %v754_v12 = vmul.f32 %v752_v10, %v752_v10 }
  0xb7   : > { %v758_v13 = vsel %vm744_vm1, %v754_v12, 0.0 }
  0xb8   : > { %759 = vadd.xlane.f32.xlu1 %v758_v13 }
 0x13d   : > { %v757_v14 = vpop.xlane.xlu1 %756 }
 0x13e   : > { %v761_v15 = vmul.f32 0.03125, %v757_v14 }
 0x140   : > { %v763_v16 = vadd.f32 1e-12, %v761_v15 }
 0x141   : > { %v760_v17 = vpop.xlane.xlu1 %759 }
 0x142   : > { %3250 = vrsqrt.f32 %v763_v16  ;;  %v762_v18 = vmul.f32 0.03125, %v760_v17 }
 0x144   : > { %v764_v19 = vadd.f32 1e-12, %v762_v18 }
 0x146   : > { %3252 = vrsqrt.f32 %v764_v19 }
 0x14f   : > { %v3251_v20 = vpop.eup %3250 }
 0x150   : > { %v767_v22 = vmul.f32 %v3251_v20, %v751_v6 }
 0x152   : > { %v775_v24 = vmul.f32 %v2926_v21, %v767_v22 }
 0x153   : > { %v3253_v25 = vpop.eup %3252 }
 0x154   : > { %v783_v26 = vadd.f32 %v2927_v23, %v775_v24  ;;  %v768_v27 = vmul.f32 %v3253_v25, %v752_v10 }
 0x156   : > { %785 = vst.msk [vmem:[#allocation2] sm:$0xff] %vm740_vm0, %v783_v26  ;;  %v776_v28 = vmul.f32 %v2926_v21, %v768_v27 }
 0x158   : > { %v784_v29 = vadd.f32 %v2927_v23, %v776_v28 }
 0x15a   : > { %786 = vst.msk [vmem:[#allocation2 + $0x8] sm:$0xf] %vm744_vm1, %v784_v29 }
 0x15b PF: > { %v792_v30 = vld [vmem:[%s3472_s22 + $0x18] sm:$0xff]  ;;  %v791_v31 = vld [vmem:[%s3472_s22 + $0x10] sm:$0xff]  ;;  %vm800_vm2 = vcmask 261120   ;;  %v790_v33 = vld [vmem:[%s3472_s22 + $0x8] sm:$0xff]  ;;  %v3336_v36 = vmov 0.0   ;;  %vm3337_vm3 = vmmov 0   ;;  %s3870_s23 = scalar_lea.vmem %s3836_s4, %s3462_s29 }
 0x15c   : > { %3058 = vmatprep.subr.mxu1 %v792_v30  ;;  %v789_v34 = vld [vmem:[%s3472_s22] sm:$0xff]  ;;  %3079 = vmatprep.subr.mxu0 %v3336_v36  ;;  %s3338_s17 = smov 120   ;;  %s3339_s26 = smov 96   ;;  %vm1571_vm4 = vcmask 1041408   ;;  %vm885_vm5 = vcmask 64512   ;;  %vm979_vm6 = vcmask 1045504  }
 0x15d   : > { %v3539_v32 = vld [vmem:[#allocation2] sm:$0xff]  ;;  %3059 = vmatpush3.msra.mxu1 %v792_v30  ;;  %3081 = vmatprep.mubr.msk.f32.mxu0 %vm3337_vm3, %v3336_v36  ;;  %s3340_s1 = smov 80   ;;  %s3341_s16 = smov 88   ;;  %vm961_vm7 = vcmask 46080   ;;  %vm975_vm8 = vcmask 48128   ;;  %vm1566_vm9 = vcmask 130048  }
 0x15e   : > { %3066 = vmatprep.mubr.msk.f32.mxu1 %vm800_vm2, %v3539_v32  ;;  %3060 = vmatprep.subr.mxu1 %v791_v31  ;;  %v2928_v38 = vld [vmem:[%s3870_s23] ss:$0 sm:$0xff]  ;;  %s3342_s18 = smov 72   ;;  %s3343_s19 = smov 112   ;;  %vm1568_vm10 = vcmask 195584   ;;  %vm2358_vm11 = vcmask 257024  }
 0x15f   : > { %3061 = vmatpush3.msra.mxu1 %v791_v31  ;;  %s3344_s30 = smov 104   ;;  %s3345_s21 = smov 64  }
 0x160   : > { %3062 = vmatprep.subr.mxu1 %v790_v33  ;;  %s3346_s22 = smov 56   ;;  %s3347_s2 = smov 40  }
 0x161   : > { %3063 = vmatpush3.msra.mxu1 %v790_v33  ;;  %v3545_v35 = vld [vmem:[#allocation2 + $0x8] sm:$0xf]  ;;  %s3348_s23 = smov 48   ;;  %p2974_p5 = scmp.ne.s32.totalorder %s3456_s28, 1 }
 0x162   : > { %3064 = vmatprep.subr.mxu1 %v789_v34 }
 0x163   : > { %3065 = vmatpush3.msra.mxu1 %v789_v34 }
 0x164   : > { %3067 = vmatmul.mubr.msk.f32.vlgmr.msra.gmra.mxu1 %vm800_vm2, %v3545_v35  ;;  %3069 = vmatprep.subr.mxu1 %v3336_v36 }
 0x165   : > { %3071 = vmatprep.mubr.msk.f32.mxu1 %vm3337_vm3, %v3336_v36 }
 0x224   : > { %v3068_v37 = vpop.f32.mrf.mxu1 }
 0x225   : > { %v879_v41 = vadd.f32 %v3068_v37, %v2928_v38 }
 0x226   : > { %v873_v39 = vpop.f32.mrf.mxu1 }
 0x227   : > { %v3560_v40 = vadd.f32 %v2928_v38, %v873_v39  ;;  %v1573_v43 = vrot.slane %v879_v41, 6 }
 0x229   : > { %1052 = vrot.lane.b32.xlu1 %v3560_v40, %s3338_s17  ;;  %883 = vrot.lane.b32.xlu0 %v3560_v40, %s3339_s26  ;;  %v1572_v42 = vrot.slane %v3560_v40, 6 }
 0x22b   : > { %v3569_v44 = vsel %vm1571_vm4, %v1572_v42, %v1573_v43 }
 0x22d   : > { %1221 = vrot.lane.b32.xlu1 %v3560_v40, %s3340_s1  ;;  %1054 = vrot.lane.b32.xlu0 %v3560_v40, %s3341_s16 }
 0x231   : > { %1388 = vrot.lane.b32.xlu1 %v3560_v40, %s3342_s18  ;;  %1219 = vrot.lane.b32.xlu0 %v3560_v40, %s3343_s19 }
 0x235   : > { %1386 = vrot.lane.b32.xlu0 %v3560_v40, %s3344_s30  ;;  %1575 = vrot.lane.b32.xlu1 %v3569_v44, %s3339_s26  ;;  %s3350_s26 = smov 16  }
 0x239   : > { %1742 = vrot.lane.b32.xlu0 %v3569_v44, %s3341_s16  ;;  %1740 = vrot.lane.b32.xlu1 %v3569_v44, %s3338_s17  ;;  %s3349_s17 = smov 8  }
 0x23d   : > { %1909 = vrot.lane.b32.xlu0 %v3569_v44, %s3340_s1  ;;  %1907 = vrot.lane.b32.xlu1 %v3569_v44, %s3343_s19  ;;  %s3351_s1 = smov 24  }
 0x241   : > { %2076 = vrot.lane.b32.xlu0 %v3569_v44, %s3342_s18  ;;  %2074 = vrot.lane.b32.xlu1 %v3569_v44, %s3344_s30  ;;  %s3871_s18 = scalar_lea.vmem %s3838_s6, %s3462_s29 }
 0x245   : > { %973 = vrot.lane.b32.xlu0 %v3560_v40, %s3345_s21  ;;  %1142 = vrot.lane.b32.xlu1 %v3560_v40, %s3346_s22 }
 0x29b   : > { %v1053_v45 = vpop.permute.xlu1 %1052  ;;  %v884_v46 = vpop.permute.xlu0 %883 }
 0x29c   : > { %3070 = vmatpush3.xpose.msk.msra.mxu1 %vm885_vm5, %v884_v46 }
 0x29d   : > { %3074 = vmatprep.subr.mxu1 %v3336_v36 }
 0x29f   : > { %v1222_v47 = vpop.permute.xlu1 %1221  ;;  %3072 = vmatmul.mubr.msk.f32.vlgmr.msra.gmra.mxu1 %vm885_vm5, %v3560_v40  ;;  %v1055_v48 = vpop.permute.xlu0 %1054 }
 0x2a0   : > { %3080 = vmatpush3.xpose.msk.msra.mxu0 %vm885_vm5, %v1055_v48  ;;  %3076 = vmatprep.mubr.msk.f32.mxu1 %vm3337_vm3, %v3336_v36 }
 0x2a1   : > { %3089 = vmatprep.subr.mxu0 %v3336_v36 }
 0x2a3   : > { %v1389_v49 = vpop.permute.xlu1 %1388  ;;  %3082 = vmatmul.mubr.msk.f32.vlgmr.msra.gmra.mxu0 %vm885_vm5, %v1053_v45  ;;  %v1220_v50 = vpop.permute.xlu0 %1219 }
 0x2a4   : > { %3090 = vmatpush3.xpose.msk.msra.mxu0 %vm885_vm5, %v1222_v47  ;;  %3091 = vmatprep.mubr.msk.f32.mxu0 %vm3337_vm3, %v3336_v36 }
 0x2a5   : > { %3099 = vmatprep.subr.mxu0 %v3336_v36 }
 0x2a7   : > { %3092 = vmatmul.mubr.msk.f32.vlgmr.msra.gmra.mxu0 %vm885_vm5, %v1220_v50  ;;  %v1387_v51 = vpop.permute.xlu0 %1386  ;;  %v1576_v52 = vpop.permute.xlu1 %1575 }
 0x2a8   : > { %3100 = vmatpush3.xpose.msk.msra.mxu0 %vm885_vm5, %v1389_v49  ;;  %3101 = vmatprep.mubr.msk.f32.mxu0 %vm3337_vm3, %v3336_v36 }
 0x2a9   : > { %3109 = vmatprep.subr.mxu0 %v3336_v36 }
 0x2ab   : > { %3102 = vmatmul.mubr.msk.f32.vlgmr.msra.gmra.mxu0 %vm885_vm5, %v1387_v51  ;;  %v1743_v53 = vpop.permute.xlu0 %1742  ;;  %v1741_v54 = vpop.permute.xlu1 %1740 }
 0x2ac   : > { %3110 = vmatpush3.xpose.msk.msra.mxu0 %vm885_vm5, %v1576_v52  ;;  %3111 = vmatprep.mubr.msk.f32.mxu0 %vm3337_vm3, %v3336_v36 }
 0x2ad   : > { %3119 = vmatprep.subr.mxu0 %v3336_v36 }
 0x2af   : > { %v1910_v55 = vpop.permute.xlu0 %1909  ;;  %3112 = vmatmul.mubr.msk.f32.vlgmr.msra.gmra.mxu0 %vm885_vm5, %v3569_v44  ;;  %v1908_v57 = vpop.permute.xlu1 %1907 }
 0x2b0   : > { %3120 = vmatpush3.xpose.msk.msra.mxu0 %vm885_vm5, %v1743_v53  ;;  %3121 = vmatprep.mubr.msk.f32.mxu0 %vm3337_vm3, %v3336_v36 }
 0x2b1   : > { %3129 = vmatprep.subr.mxu0 %v3336_v36 }
 0x2b3   : > { %v2077_v56 = vpop.permute.xlu0 %2076  ;;  %3122 = vmatmul.mubr.msk.f32.vlgmr.msra.gmra.mxu0 %vm885_vm5, %v1741_v54  ;;  %v2075_v59 = vpop.permute.xlu1 %2074 }
 0x2b4   : > { %3130 = vmatpush3.xpose.msk.msra.mxu0 %vm885_vm5, %v1910_v55  ;;  %3131 = vmatprep.mubr.msk.f32.mxu0 %vm3337_vm3, %v3336_v36 }
 0x2b5   : > { %3139 = vmatprep.subr.mxu0 %v3336_v36 }
 0x2b7   : > { %v974_v58 = vpop.permute.xlu0 %973  ;;  %3132 = vmatmul.mubr.msk.f32.vlgmr.msra.gmra.mxu0 %vm885_vm5, %v1908_v57  ;;  %v3636_v28 = vpop.permute.xlu1 %1142 }
 0x2b8   : > { %3075 = vmatpush3.msk.msra.mxu1 %vm979_vm6, %v974_v58  ;;  %3140 = vmatpush3.xpose.msk.msra.mxu0 %vm885_vm5, %v2077_v56 }
 0x2b9   : > { %3141 = vmatprep.mubr.msk.f32.mxu0 %vm3337_vm3, %v3336_v36  ;;  %3084 = vmatprep.subr.mxu1 %v3336_v36 }
 0x2bb   : > { %3142 = vmatmul.mubr.msk.f32.vlgmr.msra.gmra.mxu0 %vm885_vm5, %v2075_v59 }
 0x35f   : > { %v956_v60 = vpop.f32.mrf.mxu1 }
 0x360   : > { %v960_v61 = vmul.f32 0.35355338, %v956_v60 }
 0x361   : > { %v3073_v62 = vpop.f32.mrf.mxu1 }
 0x362   : > { %v962_v63 = vsel %vm961_vm7, %v960_v61, -inf }
 0x363   : > { %v1126_v0 = vpop.f32.mrf.mxu0  ;;  %963 = vmax.xlane.f32.xlu0 %v962_v63 }
 0x364   : > { %v1130_v1 = vmul.f32 0.35355338, %v1126_v0 }
 0x365   : > { %v3083_v2 = vpop.f32.mrf.mxu0 }
 0x366   : > { %v1131_v3 = vsel %vm961_vm7, %v1130_v1, -inf }
 0x367   : > { %v1293_v4 = vpop.f32.mrf.mxu0  ;;  %1132 = vmax.xlane.f32.xlu1 %v1131_v3 }
 0x368   : > { %v1297_v5 = vmul.f32 0.35355338, %v1293_v4 }
 0x369   : > { %v3093_v6 = vpop.f32.mrf.mxu0 }
 0x36a   : > { %v1298_v7 = vsel %vm961_vm7, %v1297_v5, -inf }
 0x36b   : > { %v1460_v8 = vpop.f32.mrf.mxu0  ;;  %1299 = vmax.xlane.f32.xlu0 %v1298_v7 }
 0x36c   : > { %v1464_v9 = vmul.f32 0.35355338, %v1460_v8 }
 0x36d   : > { %v3103_v10 = vpop.f32.mrf.mxu0 }
 0x36e   : > { %v1465_v11 = vsel %vm961_vm7, %v1464_v9, -inf }
 0x36f   : > { %1466 = vmax.xlane.f32.xlu0 %v1465_v11  ;;  %v1647_v12 = vpop.f32.mrf.mxu0 }
 0x370   : > { %v1651_v13 = vmul.f32 0.35355338, %v1647_v12 }
 0x371   : > { %v3113_v14 = vpop.f32.mrf.mxu0 }
 0x372   : > { %v1652_v15 = vsel %vm961_vm7, %v1651_v13, -inf }
 0x373   : > { %1653 = vmax.xlane.f32.xlu1 %v1652_v15  ;;  %v1814_v16 = vpop.f32.mrf.mxu0 }
 0x374   : > { %v1818_v17 = vmul.f32 0.35355338, %v1814_v16 }
 0x375   : > { %v3123_v18 = vpop.f32.mrf.mxu0 }
 0x376   : > { %v1819_v19 = vsel %vm961_vm7, %v1818_v17, -inf }
 0x377   : > { %1820 = vmax.xlane.f32.xlu0 %v1819_v19  ;;  %v1981_v20 = vpop.f32.mrf.mxu0 }
 0x378   : > { %v1985_v21 = vmul.f32 0.35355338, %v1981_v20 }
 0x379   : > { %v3133_v22 = vpop.f32.mrf.mxu0 }
 0x37a   : > { %v1986_v23 = vsel %vm961_vm7, %v1985_v21, -inf }
 0x37b   : > { %1987 = vmax.xlane.f32.xlu1 %v1986_v23  ;;  %v2148_v24 = vpop.f32.mrf.mxu0 }
 0x37c   : > { %v2152_v25 = vmul.f32 0.35355338, %v2148_v24 }
 0x37d   : > { %v3143_v26 = vpop.f32.mrf.mxu0 }
 0x37e   : > { %v2153_v27 = vsel %vm961_vm7, %v2152_v25, -inf }
 0x37f   : > { %2154 = vmax.xlane.f32.xlu0 %v2153_v27 }
 0x38c   : > { %1476 = vrot.lane.b32.xlu1 %v3560_v40, %s3347_s2 }
 0x395   : > { %1309 = vrot.lane.b32.xlu0 %v3560_v40, %s3348_s23 }
 0x3ec   : > { %v964_v29 = vpop.xlane.xlu0 %963 }
 0x3ed   : > { %v965_v30 = vsub.f32 %v960_v61, %v964_v29 }
 0x3ef   : > { %v966_v31 = vmul.f32 1.442695, %v965_v30 }
 0x3f0   : > { %v1133_v33 = vpop.xlane.xlu1 %1132 }
 0x3f1   : > { %3254 = vpow2.f32 %v966_v31  ;;  %v1134_v34 = vsub.f32 %v1130_v1, %v1133_v33 }
 0x3f3   : > { %v1135_v37 = vmul.f32 1.442695, %v1134_v34 }
 0x3f4   : > { %v1300_v38 = vpop.xlane.xlu0 %1299 }
 0x3f5   : > { %3256 = vpow2.f32 %v1135_v37  ;;  %v1301_v39 = vsub.f32 %v1297_v5, %v1300_v38 }
 0x3f7   : > { %v1302_v41 = vmul.f32 1.442695, %v1301_v39 }
 0x3f8   : > { %v1467_v42 = vpop.xlane.xlu0 %1466 }
 0x3f9   : > { %3258 = vpow2.f32 %v1302_v41  ;;  %v1468_v43 = vsub.f32 %v1464_v9, %v1467_v42 }
 0x3fb   : > { %v1469_v45 = vmul.f32 1.442695, %v1468_v43 }
 0x3fc   : > { %v1654_v53 = vpop.xlane.xlu1 %1653 }
 0x3fd   : > { %3260 = vpow2.f32 %v1469_v45  ;;  %v1655_v54 = vsub.f32 %v1651_v13, %v1654_v53 }
 0x3fe   : > { %v3255_v46 = vpop.eup %3254 }
 0x3ff   : > { %v968_v40 = vsel %vm961_vm7, %v3255_v46, 0.0  ;;  %v1656_v58 = vmul.f32 1.442695, %v1655_v54 }
 0x400   : > { %969 = vadd.xlane.f32.xlu1 %v968_v40  ;;  %v1821_v55 = vpop.xlane.xlu0 %1820 }
 0x401   : > { %v1822_v57 = vsub.f32 %v1818_v17, %v1821_v55  ;;  %3262 = vpow2.f32 %v1656_v58  ;;  %v2260_v55 = vld [vmem:[%s3477_s24] sm:$0xff] }
 0x402   : > { %v3257_v47 = vpop.eup %3256 }
 0x403   : > { %v1137_v48 = vsel %vm961_vm7, %v3257_v47, 0.0  ;;  %v1823_v61 = vmul.f32 1.442695, %v1822_v57 }
 0x404   : > { %1138 = vadd.xlane.f32.xlu0 %v1137_v48  ;;  %v1988_v56 = vpop.xlane.xlu1 %1987 }
 0x405   : > { %v1989_v59 = vsub.f32 %v1985_v21, %v1988_v56  ;;  %3264 = vpow2.f32 %v1823_v61 }
 0x406   : > { %v3259_v49 = vpop.eup %3258 }
 0x407   : > { %v1304_v50 = vsel %vm961_vm7, %v3259_v49, 0.0  ;;  %v1990_v62 = vmul.f32 1.442695, %v1989_v59 }
 0x408   : > { %1305 = vadd.xlane.f32.xlu1 %v1304_v50  ;;  %v2155_v60 = vpop.xlane.xlu0 %2154  ;;  %v1477_v9 = vpop.permute.xlu1 %1476  ;;  %v2263_v50 = vld [vmem:[%s3477_s24 + $0x18] sm:$0xff] }
 0x409   : > { %v2156_v63 = vsub.f32 %v2152_v25, %v2155_v60  ;;  %3266 = vpow2.f32 %v1990_v62 }
 0x40a   : > { %v3641_v51 = vpop.eup %3260 }
 0x40b   : > { %v1471_v52 = vsel %vm961_vm7, %v3641_v51, 0.0  ;;  %v2157_v0 = vmul.f32 1.442695, %v2156_v63 }
 0x40c   : > { %1472 = vadd.xlane.f32.xlu0 %v1471_v52  ;;  %v1310_v10 = vpop.permute.xlu0 %1309  ;;  %v2261_v52 = vld [vmem:[%s3477_s24 + $0x8] sm:$0xff] }
 0x40d   : > { %3268 = vpow2.f32 %v2157_v0 }
 0x40e   : > { %v3263_v1 = vpop.eup %3262 }
 0x40f   : > { %v1658_v3 = vsel %vm961_vm7, %v3263_v1, 0.0 }
 0x412   : > { %v3649_v2 = vpop.eup %3264 }
 0x413   : > { %v1825_v5 = vsel %vm961_vm7, %v3649_v2, 0.0 }
 0x416   : > { %v3652_v4 = vpop.eup %3266 }
 0x417   : > { %v1992_v6 = vsel %vm961_vm7, %v3652_v4, 0.0 }
 0x419   : > { %1830 = vrot.lane.b32.xlu1 %v3569_v44, %s3346_s22 }
 0x41a   : > { %v3658_v7 = vpop.eup %3268 }
 0x41b   : > { %v2159_v8 = vsel %vm961_vm7, %v3658_v7, 0.0 }
 0x422   : > { %1663 = vrot.lane.b32.xlu0 %v3569_v44, %s3345_s21  ;;  %s3872_s21 = scalar_lea.vmem %s3839_s7, %s3462_s29 }
 0x43d   : > { %1659 = vadd.xlane.f32.xlu1 %v1658_v3 }
 0x441   : > { %1826 = vadd.xlane.f32.xlu0 %v1825_v5  ;;  %1993 = vadd.xlane.f32.xlu1 %v1992_v6 }
 0x445   : > { %2160 = vadd.xlane.f32.xlu1 %v2159_v8 }
 0x456   : > { %2164 = vrot.lane.b32.xlu1 %v3569_v44, %s3347_s2  ;;  %s3873_s2 = scalar_lea.vmem %s3840_s8, %s3462_s29 }
 0x457   : > { %1997 = vrot.lane.b32.xlu0 %v3569_v44, %s3348_s23 }
 0x489   : > { %v970_v11 = vpop.xlane.xlu1 %969 }
 0x48a   : > { %3270 = vrcp.f32 %v970_v11  ;;  %v2963_v11 = vld [vmem:[%s3871_s18] ss:$0 sm:$0xff]  ;;  %s3874_s18 = sld [smem:[#allocation14_spill]] (!%p2974_p5) }
 0x48d   : > { %v1139_v12 = vpop.xlane.xlu0 %1138 }
 0x48e   : > { %3272 = vrcp.f32 %v1139_v12 }
 0x491   : > { %v1306_v13 = vpop.xlane.xlu1 %1305 }
 0x492   : > { %3274 = vrcp.f32 %v1306_v13 }
 0x495   : > { %v1473_v14 = vpop.xlane.xlu0 %1472  ;;  %v1831_v23 = vpop.permute.xlu1 %1830 }
 0x496   : > { %3276 = vrcp.f32 %v1473_v14 }
 0x497   : > { %v3271_v15 = vpop.eup %3270 }
 0x498   : > { %v972_v16 = vmul.f32 %v3271_v15, %v3255_v46 }
 0x499   : > { %v1664_v22 = vpop.permute.xlu0 %1663 }
 0x49a   : > { %3077 = vmatmul.mubr.msk.f32.vlgmr.msra.gmra.mxu1 %vm975_vm8, %v972_v16 }
 0x49b   : > { %v3273_v17 = vpop.eup %3272  ;;  %3085 = vmatpush3.msk.msra.mxu1 %vm979_vm6, %v3636_v28  ;;  %3086 = vmatprep.mubr.msk.f32.mxu1 %vm3337_vm3, %v3336_v36 }
 0x49c   : > { %3094 = vmatprep.subr.mxu1 %v3336_v36  ;;  %v1141_v44 = vmul.f32 %v3273_v17, %v3257_v47 }
 0x49e   : > { %3087 = vmatmul.mubr.msk.f32.vlgmr.msra.gmra.mxu1 %vm975_vm8, %v1141_v44 }
 0x49f   : > { %v3275_v18 = vpop.eup %3274  ;;  %3095 = vmatpush3.msk.msra.mxu1 %vm979_vm6, %v1310_v10  ;;  %3096 = vmatprep.mubr.msk.f32.mxu1 %vm3337_vm3, %v3336_v36 }
 0x4a0   : > { %3104 = vmatprep.subr.mxu1 %v3336_v36  ;;  %v1308_v19 = vmul.f32 %v3275_v18, %v3259_v49 }
 0x4a2   : > { %3097 = vmatmul.mubr.msk.f32.vlgmr.msra.gmra.mxu1 %vm975_vm8, %v1308_v19 }
 0x4a3   : > { %v3277_v20 = vpop.eup %3276  ;;  %3105 = vmatpush3.msk.msra.mxu1 %vm979_vm6, %v1477_v9  ;;  %3106 = vmatprep.mubr.msk.f32.mxu1 %vm3337_vm3, %v3336_v36 }
 0x4a4   : > { %3114 = vmatprep.subr.mxu1 %v3336_v36  ;;  %v1475_v21 = vmul.f32 %v3277_v20, %v3641_v51  ;;  %v2262_v51 = vld [vmem:[%s3477_s24 + $0x10] sm:$0xff] }
 0x4a6   : > { %3107 = vmatmul.mubr.msk.f32.vlgmr.msra.gmra.mxu1 %vm975_vm8, %v1475_v21 }
 0x4a7   : > { %3115 = vmatpush3.msk.msra.mxu1 %vm979_vm6, %v1664_v22  ;;  %3116 = vmatprep.mubr.msk.f32.mxu1 %vm3337_vm3, %v3336_v36 }
 0x4a8   : > { %3124 = vmatprep.subr.mxu1 %v3336_v36 }
 0x4c6   : > { %v1660_v24 = vpop.xlane.xlu1 %1659 }
 0x4c7   : > { %3278 = vrcp.f32 %v1660_v24 }
 0x4ca   : > { %v1827_v25 = vpop.xlane.xlu0 %1826  ;;  %v1994_v26 = vpop.xlane.xlu1 %1993 }
 0x4cb   : > { %3280 = vrcp.f32 %v1827_v25 }
 0x4cc   : > { %3282 = vrcp.f32 %v1994_v26 }
 0x4ce   : > { %v2161_v27 = vpop.xlane.xlu1 %2160  ;;  %v1998_v34 = vpop.permute.xlu0 %1997 }
 0x4cf   : > { %3284 = vrcp.f32 %v2161_v27  ;;  %v2402_v27 = vld [vmem:[%s3494_s3 + $0x18] sm:$0xff] }
 0x4d2   : > { %v2165_v39 = vpop.permute.xlu1 %2164 }
 0x4d4   : > { %v3279_v28 = vpop.eup %3278 }
 0x4d5   : > { %v1662_v29 = vmul.f32 %v3279_v28, %v3263_v1  ;;  %v2401_v28 = vld [vmem:[%s3494_s3 + $0x10] sm:$0xff] }
 0x4d7   : > { %3117 = vmatmul.mubr.msk.f32.vlgmr.msra.gmra.mxu1 %vm975_vm8, %v1662_v29  ;;  %v2400_v29 = vld [vmem:[%s3494_s3 + $0x8] sm:$0xff] }
 0x4d8   : > { %v3281_v30 = vpop.eup %3280  ;;  %3125 = vmatpush3.msk.msra.mxu1 %vm979_vm6, %v1831_v23  ;;  %3126 = vmatprep.mubr.msk.f32.mxu1 %vm3337_vm3, %v3336_v36 }
 0x4d9   : > { %3134 = vmatprep.subr.mxu1 %v3336_v36  ;;  %v1829_v31 = vmul.f32 %v3281_v30, %v3649_v2  ;;  %v3283_v33 = vpop.eup %3282  ;;  %v2399_v30 = vld [vmem:[%s3494_s3] sm:$0xff] }
 0x4da   : > { %v1996_v37 = vmul.f32 %v3283_v33, %v3652_v4 }
 0x4db   : > { %3127 = vmatmul.mubr.msk.f32.vlgmr.msra.gmra.mxu1 %vm975_vm8, %v1829_v31 }
 0x4dc   : > { %3135 = vmatpush3.msk.msra.mxu1 %vm979_vm6, %v1998_v34  ;;  %3136 = vmatprep.mubr.msk.f32.mxu1 %vm3337_vm3, %v3336_v36  ;;  %v3285_v38 = vpop.eup %3284 }
 0x4dd   : > { %3144 = vmatprep.subr.mxu1 %v3336_v36  ;;  %v2163_v41 = vmul.f32 %v3285_v38, %v3658_v7 }
 0x4df   : > { %3137 = vmatmul.mubr.msk.f32.vlgmr.msra.gmra.mxu1 %vm975_vm8, %v1996_v37 }
 0x4e0   : > { %3145 = vmatpush3.msk.msra.mxu1 %vm979_vm6, %v2165_v39  ;;  %3146 = vmatprep.mubr.msk.f32.mxu1 %vm3337_vm3, %v3336_v36 }
 0x4e1   : > { %3149 = vmatprep.subr.mxu1 %v2263_v50 }
 0x4e3   : > { %3147 = vmatmul.mubr.msk.f32.vlgmr.msra.gmra.mxu1 %vm975_vm8, %v2163_v41 }
 0x4e4   : > { %3150 = vmatpush3.msra.mxu1 %v2263_v50 }
 0x4e5   : > { %3151 = vmatprep.subr.mxu1 %v2262_v51 }
 0x4e6   : > { %3152 = vmatpush3.msra.mxu1 %v2262_v51  ;;  %v2523_v51 = vld [vmem:[%s3504_s27 + $0x70] sm:$0xff] }
 0x4e7   : > { %3153 = vmatprep.subr.mxu1 %v2261_v52 }
 0x4e8   : > { %3154 = vmatpush3.msra.mxu1 %v2261_v52  ;;  %v2522_v52 = vld [vmem:[%s3504_s27 + $0x68] sm:$0xff] }
 0x4e9   : > { %3155 = vmatprep.subr.mxu1 %v2260_v55 }
 0x4ea   : > { %3156 = vmatpush3.msra.mxu1 %v2260_v55  ;;  %v2519_v55 = vld [vmem:[%s3504_s27 + $0x50] sm:$0xff] }
 0x4eb   : > { %3160 = vmatprep.subr.mxu1 %v2402_v27 }
 0x55a   : > { %v1048_v42 = vpop.f32.mrf.mxu1 }
 0x55c   : > { %v3078_v43 = vpop.f32.mrf.mxu1 }
 0x55e   : > { %v1215_v45 = vpop.f32.mrf.mxu1 }
 0x55f   : > { %1554 = vrot.lane.b32.xlu0 %v1215_v45, %s3349_s17  ;;  %v2967_v45 = vld [vmem:[%s3873_s2] ss:$0 sm:$0xff] }
 0x560   : > { %v3088_v46 = vpop.f32.mrf.mxu1 }
 0x562   : > { %v1382_v40 = vpop.f32.mrf.mxu1 }
 0x564   : > { %v3098_v47 = vpop.f32.mrf.mxu1 }
 0x566   : > { %v1549_v48 = vpop.f32.mrf.mxu1 }
 0x568   : > { %v3108_v49 = vpop.f32.mrf.mxu1 }
 0x597   : > { %v1736_v36 = vpop.f32.mrf.mxu1 }
 0x599   : > { %v3118_v53 = vpop.f32.mrf.mxu1 }
 0x59a   : > { %v2521_v53 = vld [vmem:[%s3504_s27 + $0x60] sm:$0xff] }
 0x59b   : > { %v1903_v54 = vpop.f32.mrf.mxu1 }
 0x59c   : > { %2242 = vrot.lane.b32.xlu0 %v1903_v54, %s3349_s17  ;;  %v2520_v54 = vld [vmem:[%s3504_s27 + $0x58] sm:$0xff] }
 0x59d   : > { %v3128_v56 = vpop.f32.mrf.mxu1 }
 0x59e   : > { %v2518_v56 = vld [vmem:[%s3504_s27 + $0x48] sm:$0xff] }
 0x59f   : > { %v2070_v57 = vpop.f32.mrf.mxu1 }
 0x5a0   : > { %1558 = vrot.lane.b32.xlu0 %v1382_v40, %s3350_s26  ;;  %2246 = vrot.lane.b32.xlu1 %v2070_v57, %s3350_s26  ;;  %v2517_v57 = vld [vmem:[%s3504_s27 + $0x40] sm:$0xff]  ;;  %s3876_s26 = sld [smem:[#allocation13_spill]] (!%p2974_p5) }
 0x5a1   : > { %v3138_v58 = vpop.f32.mrf.mxu1 }
 0x5a2   : > { %v2516_v58 = vld [vmem:[%s3504_s27 + $0x38] sm:$0xff] }
 0x5a3   : > { %v2237_v59 = vpop.f32.mrf.mxu1 }
 0x5a4   : > { %2250 = vrot.lane.b32.xlu1 %v2237_v59, %s3351_s1  ;;  %v2515_v59 = vld [vmem:[%s3504_s27 + $0x30] sm:$0xff] }
 0x5a5   : > { %v3148_v60 = vpop.f32.mrf.mxu1 }
 0x5a6   : > { %v2514_v60 = vld [vmem:[%s3504_s27 + $0x28] sm:$0xff] }
 0x5a8   : > { %1562 = vrot.lane.b32.xlu1 %v1549_v48, %s3351_s1 }
 0x5d1   : > { %v1555_v61 = vpop.permute.xlu0 %1554 }
 0x5d2   : > { %v1565_v5 = vsel %vm885_vm5, %v1048_v42, %v1555_v61  ;;  %v2966_v42 = vld [vmem:[%s3872_s21] ss:$0 sm:$0xff]  ;;  %s3875_s21 = sld [smem:[#allocation12_spill]] (!%p2974_p5) }
 0x5d3   : > { %v2513_v61 = vld [vmem:[%s3504_s27 + $0x20] sm:$0xff] }
 0x60e   : > { %v2243_v62 = vpop.permute.xlu0 %2242 }
 0x60f   : > { %v2253_v0 = vsel %vm885_vm5, %v1736_v36, %v2243_v62  ;;  %v2524_v36 = vld [vmem:[%s3504_s27 + $0x78] sm:$0xff] }
 0x610   : > { %3171 = vmatprep.subr.mxu0 %v2524_v36  ;;  %v2512_v62 = vld [vmem:[%s3504_s27 + $0x18] sm:$0xff] }
 0x611   : > { %3172 = vmatpush3.msra.mxu0 %v2524_v36 }
 0x612   : > { %v2247_v63 = vpop.permute.xlu1 %2246  ;;  %v1559_v3 = vpop.permute.xlu0 %1558  ;;  %3173 = vmatprep.subr.mxu0 %v2523_v51 }
 0x613   : > { %v2254_v1 = vsel %vm1566_vm9, %v2253_v0, %v2247_v63  ;;  %v1567_v6 = vsel %vm1566_vm9, %v1565_v5, %v1559_v3  ;;  %3174 = vmatpush3.msra.mxu0 %v2523_v51  ;;  %v2511_v63 = vld [vmem:[%s3504_s27 + $0x10] sm:$0xff]  ;;  %v2510_v0 = vld [vmem:[%s3504_s27 + $0x8] sm:$0xff]  ;;  %v2972_v51 = vld [vmem:[%s728_s20] ss:$0 sm:$0xff] }
 0x614   : > { %3175 = vmatprep.subr.mxu0 %v2522_v52 }
 0x615   : > { %3176 = vmatpush3.msra.mxu0 %v2522_v52 }
 0x616   : > { %v2251_v2 = vpop.permute.xlu1 %2250  ;;  %3177 = vmatprep.subr.mxu0 %v2521_v53 }
 0x617   : > { %v2255_v4 = vsel %vm1568_vm10, %v2254_v1, %v2251_v2  ;;  %3178 = vmatpush3.msra.mxu0 %v2521_v53  ;;  %v2509_v1 = vld [vmem:[%s3504_s27] sm:$0xff] }
 0x618   : > { %v2257_v7 = vrot.slane %v2255_v4, 2  ;;  %3179 = vmatprep.subr.mxu0 %v2520_v54  ;;  %v2968_v2 = vld [vmem:[%s717_s5] ss:$0 sm:$0xff] }
 0x619   : > { %3180 = vmatpush3.msra.mxu0 %v2520_v54  ;;  %v2973_v54 = vld [vmem:[%s731_s15] ss:$0 sm:$0xff] }
 0x61a   : > { %v1563_v8 = vpop.permute.xlu1 %1562  ;;  %3181 = vmatprep.subr.mxu0 %v2519_v55 }
 0x61b   : > { %v1569_v9 = vsel %vm1568_vm10, %v1567_v6, %v1563_v8  ;;  %3182 = vmatpush3.msra.mxu0 %v2519_v55 }
 0x61c   : > { %v2259_v10 = vsel %vm979_vm6, %v1569_v9, %v2257_v7  ;;  %3183 = vmatprep.subr.mxu0 %v2518_v56 }
 0x61d   : > { %3157 = vmatprep.mubr.msk.f32.mxu1 %vm800_vm2, %v2259_v10  ;;  %3184 = vmatpush3.msra.mxu0 %v2518_v56 }
 0x61e   : > { %3158 = vmatmul.mubr.msk.f32.vlgmr.msra.gmra.mxu1 %vm800_vm2, %v2257_v7  ;;  %3185 = vmatprep.subr.mxu0 %v2517_v57 }
 0x61f   : > { %3161 = vmatpush3.msra.mxu1 %v2402_v27  ;;  %3186 = vmatpush3.msra.mxu0 %v2517_v57 }
 0x620   : > { %3162 = vmatprep.subr.mxu1 %v2401_v28  ;;  %3187 = vmatprep.subr.mxu0 %v2516_v58 }
 0x621   : > { %3163 = vmatpush3.msra.mxu1 %v2401_v28  ;;  %3188 = vmatpush3.msra.mxu0 %v2516_v58 }
 0x622   : > { %3164 = vmatprep.subr.mxu1 %v2400_v29  ;;  %3189 = vmatprep.subr.mxu0 %v2515_v59 }
 0x623   : > { %3165 = vmatpush3.msra.mxu1 %v2400_v29  ;;  %3190 = vmatpush3.msra.mxu0 %v2515_v59 }
 0x624   : > { %3166 = vmatprep.subr.mxu1 %v2399_v30  ;;  %3191 = vmatprep.subr.mxu0 %v2514_v60 }
 0x625   : > { %3167 = vmatpush3.msra.mxu1 %v2399_v30  ;;  %3192 = vmatpush3.msra.mxu0 %v2514_v60 }
 0x626   : > { %3193 = vmatprep.subr.mxu0 %v2513_v61 }
 0x627   : > { %3194 = vmatpush3.msra.mxu0 %v2513_v61 }
 0x628   : > { %3195 = vmatprep.subr.mxu0 %v2512_v62 }
 0x629   : > { %3196 = vmatpush3.msra.mxu0 %v2512_v62 }
 0x62a   : > { %3197 = vmatprep.subr.mxu0 %v2511_v63 }
 0x62b   : > { %3198 = vmatpush3.msra.mxu0 %v2511_v63 }
 0x62c   : > { %3199 = vmatprep.subr.mxu0 %v2510_v0 }
 0x62d   : > { %3200 = vmatpush3.msra.mxu0 %v2510_v0 }
 0x62e   : > { %3201 = vmatprep.subr.mxu0 %v2509_v1 }
 0x62f   : > { %3202 = vmatpush3.msra.mxu0 %v2509_v1 }
 0x6de   : > { %v3159_v12 = vpop.f32.mrf.mxu1 }
 0x6df   : > { %v2348_v13 = vadd.f32 %v3159_v12, %v2963_v11 }
 0x6e0   : > { %v2342_v14 = vpop.f32.mrf.mxu1 }
 0x6e1   : > { %v2343_v15 = vadd.f32 %v2963_v11, %v2342_v14  ;;  %v2352_v16 = vadd.f32 %v2348_v13, %v3545_v35 }
 0x6e3   : > { %v2359_v17 = vsel %vm2358_vm11, %v2352_v16, 0.0  ;;  %v2351_v44 = vadd.f32 %v2343_v15, %v3539_v32 }
 0x6e4   : > { %2360 = vadd.xlane.f32.xlu1 %v2359_v17 }
 0x6e5   : > { %v2355_v18 = vsel %vm800_vm2, %v2351_v44, 0.0 }
 0x6e6   : > { %2356 = vadd.xlane.f32.xlu0 %v2355_v18 }
 0x76d   : > { %v2361_v19 = vpop.xlane.xlu1 %2360 }
 0x76e   : > { %v2364_v20 = vmul.f32 0.03125, %v2361_v19 }
 0x76f   : > { %v2357_v21 = vpop.xlane.xlu0 %2356 }
 0x770   : > { %v2363_v22 = vmul.f32 0.03125, %v2357_v21  ;;  %v2366_v23 = vsub.f32 %v2352_v16, %v2364_v20 }
 0x772   : > { %v2365_v24 = vsub.f32 %v2351_v44, %v2363_v22  ;;  %v2368_v26 = vmul.f32 %v2366_v23, %v2366_v23 }
 0x774   : > { %v2367_v25 = vmul.f32 %v2365_v24, %v2365_v24  ;;  %v2372_v32 = vsel %vm2358_vm11, %v2368_v26, 0.0 }
 0x776   : > { %v2369_v35 = vsel %vm800_vm2, %v2367_v25, 0.0 }
 0x777   : > { %2370 = vadd.xlane.f32.xlu0 %v2369_v35 }
 0x77b   : > { %2373 = vadd.xlane.f32.xlu0 %v2372_v32 }
 0x800   : > { %v2371_v31 = vpop.xlane.xlu0 %2370 }
 0x801   : > { %v2375_v33 = vmul.f32 0.03125, %v2371_v31 }
 0x803   : > { %v2377_v34 = vadd.f32 1e-12, %v2375_v33 }
 0x804   : > { %v2374_v37 = vpop.xlane.xlu0 %2373 }
 0x805   : > { %3286 = vrsqrt.f32 %v2377_v34  ;;  %v2376_v38 = vmul.f32 0.03125, %v2374_v37 }
 0x807   : > { %v2378_v39 = vadd.f32 1e-12, %v2376_v38 }
 0x809   : > { %3288 = vrsqrt.f32 %v2378_v39 }
 0x812   : > { %v3287_v41 = vpop.eup %3286 }
 0x813   : > { %v2381_v43 = vmul.f32 %v3287_v41, %v2365_v24  ;;  %v2971_v24 = vld [vmem:[%s725_s0] ss:$0 sm:$0xff] }
 0x815   : > { %v2389_v46 = vmul.f32 %v2966_v42, %v2381_v43 }
 0x816   : > { %v3289_v40 = vpop.eup %3288 }
 0x817   : > { %v2382_v47 = vmul.f32 %v3289_v40, %v2366_v23  ;;  %v3740_v48 = vadd.f32 %v2967_v45, %v2389_v46 }
 0x819   : > { %v2390_v49 = vmul.f32 %v2966_v42, %v2382_v47  ;;  %3168 = vmatprep.mubr.msk.f32.mxu1 %vm800_vm2, %v3740_v48 }
 0x81b   : > { %v3744_v50 = vadd.f32 %v2967_v45, %v2390_v49 }
 0x81d   : > { %3169 = vmatmul.mubr.msk.f32.vlgmr.msra.gmra.mxu1 %vm800_vm2, %v3744_v50 }
 0x8dd   : > { %v3170_v3 = vpop.f32.mrf.mxu1 }
 0x8de   : > { %v2488_v4 = vadd.f32 %v3170_v3, %v2968_v2 }
 0x8df   : > { %v2482_v5 = vpop.f32.mrf.mxu1 }
 0x8e0   : > { %v2492_v6 = vmul.f32 %v2488_v4, %v2488_v4  ;;  %v2483_v7 = vadd.f32 %v2968_v2, %v2482_v5 }
 0x8e2   : > { %v2494_v8 = vmul.f32 %v2492_v6, %v2488_v4  ;;  %v2491_v9 = vmul.f32 %v2483_v7, %v2483_v7 }
 0x8e4   : > { %v2496_v10 = vmul.f32 0.044715, %v2494_v8  ;;  %v2493_v11 = vmul.f32 %v2491_v9, %v2483_v7 }
 0x8e6   : > { %v2498_v12 = vadd.f32 %v2496_v10, %v2488_v4  ;;  %v2495_v13 = vmul.f32 0.044715, %v2493_v11 }
 0x8e8   : > { %v2500_v14 = vmul.f32 0.7978846, %v2498_v12  ;;  %v2497_v15 = vadd.f32 %v2495_v13, %v2483_v7 }
 0x8ea   : > { %3290 = vtanh.f32 %v2500_v14  ;;  %v2499_v16 = vmul.f32 0.7978846, %v2497_v15 }
 0x8ec   : > { %3292 = vtanh.f32 %v2499_v16 }
 0x8f7   : > { %v3291_v17 = vpop.eup %3290 }
 0x8f8   : > { %v2504_v44 = vadd.f32 1.0, %v3291_v17 }
 0x8f9   : > { %v3293_v18 = vpop.eup %3292 }
 0x8fa   : > { %v2503_v19 = vadd.f32 1.0, %v3293_v18  ;;  %v2506_v20 = vmul.f32 0.5, %v2504_v44 }
 0x8fc   : > { %v2505_v21 = vmul.f32 0.5, %v2503_v19  ;;  %v2508_v23 = vmul.f32 %v2506_v20, %v2488_v4 }
 0x8fe   : > { %v2507_v22 = vmul.f32 %v2505_v21, %v2483_v7 }
 0x900   : > { %3203 = vmatprep.mubr.f32.mxu0 %v2507_v22 }
 0x901   : > { %3204 = vmatmul.mubr.f32.vlgmr.msra.gmra.mxu0 %v2508_v23 }
 0x9c1   : > { %v3205_v25 = vpop.f32.mrf.mxu0 }
 0x9c2   : > { %v2604_v35 = vadd.f32 %v3205_v25, %v2971_v24 }
 0x9c3   : > { %v2598_v26 = vpop.f32.mrf.mxu0 }
 0x9c4   : > { %v2599_v32 = vadd.f32 %v2971_v24, %v2598_v26  ;;  %v2608_v27 = vadd.f32 %v2604_v35, %v3744_v50 }
 0x9c6   : > { %v2614_v28 = vsel %vm2358_vm11, %v2608_v27, 0.0  ;;  %v2607_v29 = vadd.f32 %v2599_v32, %v3740_v48 }
 0x9c7   : > { %2615 = vadd.xlane.f32.xlu0 %v2614_v28 }
 0x9c8   : > { %v2611_v30 = vsel %vm800_vm2, %v2607_v29, 0.0 }
 0x9c9   : > { %2612 = vadd.xlane.f32.xlu1 %v2611_v30 }
 0xa50   : > { %v2616_v31 = vpop.xlane.xlu0 %2615 }
 0xa51   : > { %v2618_v33 = vmul.f32 0.03125, %v2616_v31 }
 0xa52   : > { %v2613_v34 = vpop.xlane.xlu1 %2612 }
 0xa53   : > { %v2620_v37 = vsub.f32 %v2608_v27, %v2618_v33  ;;  %v2617_v38 = vmul.f32 0.03125, %v2613_v34 }
 0xa55   : > { %v2619_v39 = vsub.f32 %v2607_v29, %v2617_v38  ;;  %v2622_v41 = vmul.f32 %v2620_v37, %v2620_v37 }
 0xa57   : > { %v2626_v42 = vsel %vm2358_vm11, %v2622_v41, 0.0  ;;  %v2621_v43 = vmul.f32 %v2619_v39, %v2619_v39 }
 0xa58   : > { %2627 = vadd.xlane.f32.xlu0 %v2626_v42 }
 0xa59   : > { %v2623_v45 = vsel %vm800_vm2, %v2621_v43, 0.0 }
 0xa5a   : > { %2624 = vadd.xlane.f32.xlu1 %v2623_v45 }
 0xae1   : > { %v2628_v46 = vpop.xlane.xlu0 %2627 }
 0xae2   : > { %v2630_v40 = vmul.f32 0.03125, %v2628_v46 }
 0xae3   : > { %v2625_v47 = vpop.xlane.xlu1 %2624 }
 0xae4   : > { %v2632_v48 = vadd.f32 1e-12, %v2630_v40  ;;  %v2629_v49 = vmul.f32 0.03125, %v2625_v47 }
 0xae6   : > { %3294 = vrsqrt.f32 %v2632_v48  ;;  %v2631_v50 = vadd.f32 1e-12, %v2629_v49 }
 0xae8   : > { %3296 = vrsqrt.f32 %v2631_v50 }
 0xaf3   : > { %v3295_v36 = vpop.eup %3294 }
 0xaf4   : > { %v2636_v52 = vmul.f32 %v3295_v36, %v2620_v37 }
 0xaf5   : > { %v3297_v53 = vpop.eup %3296 }
 0xaf6   : > { %v2644_v55 = vmul.f32 %v2972_v51, %v2636_v52  ;;  %v2635_v56 = vmul.f32 %v3297_v53, %v2619_v39 }
 0xaf8   : > { %v2652_v57 = vadd.f32 %v2973_v54, %v2644_v55  ;;  %v2643_v58 = vmul.f32 %v2972_v51, %v2635_v56  ;;  %2658 = sbr.rel (%p2974_p5) target bundleno = 3032 (0xbd8), region = 96 }
 0xafa   : > { %2654 = vst.msk [vmem:[#allocation2 + $0x8] sm:$0xf] %vm2358_vm11, %v2652_v57  ;;  %v2651_v59 = vadd.f32 %v2973_v54, %v2643_v58 }
 0xafc   : > { %2653 = vst.msk [vmem:[#allocation2] sm:$0xff] %vm800_vm2, %v2651_v59 }
 0xafd   : > { %2659 = vst.msk [vmem:[%s3874_s18] sm:$0xff] %vm800_vm2, %v2651_v59  ;;  %v2669_v60 = vld [vmem:[%s3875_s21 + $0x18] sm:$0xff]  ;;  %v3352_v61 = vmov 0.0   ;;  %v2668_v62 = vld [vmem:[%s3875_s21 + $0x10] sm:$0xff]  ;;  %vm3353_vm12 = vmmov 0   ;;  %v2662_v63 = vrot.slane %v2651_v59, 5 }
 0xafe   : > { %2660 = vst.msk [vmem:[%s3874_s18 + $0x8] sm:$0xf] %vm2358_vm11, %v2652_v57  ;;  %3206 = vmatprep.subr.mxu0 %v3352_v61  ;;  %3214 = vmatprep.mubr.msk.f32.mxu0 %vm3353_vm12, %v3352_v61  ;;  %v2667_v0 = vld [vmem:[%s3875_s21 + $0x8] sm:$0xff]  ;;  %vm2664_vm13 = vcmask 1040384   ;;  %v2666_v1 = vld [vmem:[%s3875_s21] sm:$0xff]  ;;  %vm2751_vm14 = vcmask 254976  }
 0xaff   : > { %3207 = vmatpush3.msra.mxu0 %v2669_v60  ;;  %v2665_v2 = vsel %vm2664_vm13, %v2651_v59, %v2662_v63  ;;  %v2975_v3 = vld [vmem:[%s3876_s26] ss:$0 sm:$0xff] }
 0xb00   : > { %3208 = vmatprep.subr.mxu0 %v3352_v61 }
 0xb01   : > { %3209 = vmatpush3.msra.mxu0 %v2668_v62 }
 0xb02   : > { %3210 = vmatprep.subr.mxu0 %v3352_v61 }
 0xb03   : > { %3211 = vmatpush3.msra.mxu0 %v2667_v0 }
 0xb04   : > { %3212 = vmatprep.subr.mxu0 %v3352_v61 }
 0xb05   : > { %3213 = vmatpush3.msra.mxu0 %v2666_v1 }
 0xb06   : > { %3215 = vmatmul.mubr.msk.f32.vlgmr.msra.gmra.mxu0 %vm800_vm2, %v2665_v2 }
 0xbc6   : > { %v2746_v4 = vpop.f32.mrf.mxu0 }
 0xbc7   : > { %v2747_v5 = vadd.f32 %v2975_v3, %v2746_v4 }
 0xbc8   : > { %v3216_v6 = vpop.f32.mrf.mxu0 }
 0xbc9   : > { %3298 = vtanh.f32 %v2747_v5 }
 0xbd6   : > { %v3299_v7 = vpop.eup %3298 }
 0xbd7   : > { %2752 = vst.msk [vmem:[#allocation3] sm:$0x3] %vm2751_vm14, %v3299_v7 }
 0xbd8 PF: > { %p3221_p6 = scmp.eq.s32.totalorder %s3456_s28, 1  ;;  %s3354_s1 = smov [#allocation3]  }
 0xbd9   : > { %s2763_s24 = sshll.u32 %s3354_s1, 4  ;;  %s2764_s24 = int_to_ptr.vmem [resolvable:$true] %s2763_s24 }
 0xbda   : > { %s3300_s20 = scalar_lea.vmem %s2764_s24, 32  ;;  %p3307_p10 = scmp.lt.s32.totalorder %s2764_s24, %s2764_s24 }
 0xbdb   : > { %p3301_p7 = scmp.ne.s32.totalorder %s2764_s24, %s3300_s20  ;;  %p3308_p11 = scmp.lt.s32.totalorder %s3300_s20, %s3300_s20 }
 0xbdd   : > { %p3302_p8 = pnand %p3301_p7, %p3221_p6  ;;  %p3309_p12 = por %p3308_p11, %p3307_p10 }
 0xbdf   : > { %p3303_p9 = pneg %p3302_p8 }
 0xbe1   : > { %p3310_p13 = pnand %p3309_p12, %p3303_p9 }
 0xbe3   : > { %3313 = shalt.err (!%p3310_p13)
}
 0xbe4   : > { %s3877_s15 = sld [smem:[#allocation15_spill]] }
 0xbea   : > { %3218 = dma.vmem_to_hbm [thread:$0]  (%p3221_p6), %s2764_s24, 32, %s3877_s15, [#allocation4]  }
 0xbeb   : > { %3329 = dma.done.wait (%p3221_p6), [#allocation4], 32  }
 0xbec   : > { %3331 = vsyncadd (%p3221_p6), [#allocation4], 4294967264 }
 0xbed PF: > { %s3878_s19 = sld [smem:[#allocation6_spill]] }
 0xbf3   : > { %s30_s27 = sadd.s32 1, %s3878_s19  }
 0xbf4   : > { %p27_p0 = scmp.ge.s32.totalorder %s30_s27, 4  }
 0xbf6   :  { %29 = sbr.rel (!%p27_p0) target bundleno = 11 (0xb), region = 164 }
 0xbfb   :  { %2779 = vsyncpa [#allocation4], 1 }
 0xbfc   :  { %2781 = vsyncpa [#allocation4 + $0x1], 1 }

</bundles_post_ra>
